<compile_context>
chip_gen: v7x
topology: tpu7x:2x2x1
jax: 0.10.0
libtpu: 0.0.40
codegen_flags: <defaults>
</compile_context>

<pallas_src>
import math
import functools

import jax
import jax.numpy as jnp
from jax.experimental import pallas as pl
from jax.experimental.pallas import tpu as pltpu

# Module constants (from the PyTorch spec).
D_MODEL = 64
NUM_HEADS = 4
MEM_LEN = 40
D_HEAD = D_MODEL // NUM_HEADS


# ----------------------------- fused Pallas kernel ---------------------------------


def _fused_rel_attn_kernel(q_ref, k_ref, v_ref, w_ref, b_ref, u_ref, vv_ref, r_ref,
                           o_ref, qp_s, kp_s, vp_s, att_s, *, B, H, D, DH):
    # q_ref: (T, B*D)   k_ref/v_ref: (S, B*D)   -- time-major, batch folded into lanes
    # w_ref: (4, D, D) stacked [wq, wk, wv, wo] (x @ W layout), b_ref: (4, 1, D) biases
    # u_ref/vv_ref: (1, D) = (1, H*DH) per-head biases, head-major in lanes
    # r_ref: (T, S, DH) gathered relative embeddings (shared across batch/heads)
    # o_ref: (T, B*D) lane-dense output
    scale = 1.0 / math.sqrt(DH)
    r = r_ref[...]                                            # (T, S, DH)
    wq, wk, wv, wo = w_ref[0], w_ref[1], w_ref[2], w_ref[3]   # each (D, D)
    bq, bk, bv, bo = b_ref[0], b_ref[1], b_ref[2], b_ref[3]   # each (1, D)

    for b in range(B):                                        # static unroll (B small)
        cs = slice(b * D, (b + 1) * D)
        # Fused Q/K/V projections for this batch column; results stay in VMEM scratch.
        qp_s[...] = jnp.dot(q_ref[:, cs], wq, preferred_element_type=jnp.float32) + bq
        kp_s[...] = jnp.dot(k_ref[:, cs], wk, preferred_element_type=jnp.float32) + bk
        vp_s[...] = jnp.dot(v_ref[:, cs], wv, preferred_element_type=jnp.float32) + bv

        for h in range(H):                                    # static unroll (H small)
            hs = slice(h * DH, (h + 1) * DH)
            q_h = qp_s[:, hs]                                 # (T, DH)
            k_h = kp_s[:, hs]                                 # (S, DH)
            v_h = vp_s[:, hs]                                 # (S, DH)

            # Fuse u/v biases into the query (standard Transformer-XL formulation).
            q_u = q_h + u_ref[:, hs]                          # (T, DH)
            q_v = q_h + vv_ref[:, hs]                         # (T, DH)

            # AC + UB = (q + u) @ k^T  -> single MXU matmul (contract DH, no transpose).
            acub = jax.lax.dot_general(
                q_u, k_h, (((1,), (1,)), ((), ())),
                preferred_element_type=jnp.float32)           # (T, S)
            # AP + VB = (q + v) contracted with R over DH, t batched -> MXU batched dot
            # (replaces the old VPU broadcast-multiply + XLU reduce).
            apvb = jnp.einsum("tqd,tsd->tqs", q_v[:, None, :], r,
                              preferred_element_type=jnp.float32)[:, 0, :]  # (T, S)

            scores = (acub + apvb) * scale
            m = jnp.max(scores, axis=-1, keepdims=True)
            p = jnp.exp(scores - m)
            # One reciprocal per row; normalize after the attn @ V matmul (cheaper than
            # dividing the full (T, S) probs). Exact here; approx=True in production.
            inv = pl.reciprocal(jnp.sum(p, axis=-1, keepdims=True))
            out_h = jnp.dot(p, v_h, preferred_element_type=jnp.float32) * inv  # (T, DH)
            att_s[:, hs] = out_h

        # Fused output projection; lane-dense (T, D) store into the (T, B*D) output block.
        o_ref[:, cs] = jnp.dot(att_s[...], wo, preferred_element_type=jnp.float32) + bo


# ------------------------------ forward wrapper --------------------------------


def rel_multihead_attention(query, key, value, params, memory_length=0):
    T, B, D = query.shape
    S = key.shape[0]
    H = NUM_HEADS
    DH = D // H

    # Relative-position embedding gather: reproduces the PyTorch code exactly, including the
    # (S, T)-shaped dist being flattened and re-viewed as (T, S, d_head).
    # TODO(synk): for T != S this reshape scrambles query/key indices exactly like the PyTorch
    # module; at production sizes replace with a rel-shift formulation (no (T,S,DH) tensor).
    dist = jnp.arange(S)[:, None] - jnp.arange(T)[None, :] - memory_length
    idxs = jnp.clip(dist + (MEM_LEN - 1), 0, 2 * MEM_LEN - 2)
    R = params["rel_emb"][idxs.reshape(-1)].reshape(T, S, DH)

    w_stack = jnp.stack([params["wq"], params["wk"], params["wv"], params["wo"]])  # (4, D, D)
    b_stack = jnp.stack([params["bq"], params["bk"], params["bv"], params["bo"]])  # (4, 1, D)
    u_flat = params["u"].reshape(1, D)   # (H, DH) -> (1, H*DH), head-major lanes
    v_flat = params["v"].reshape(1, D)

    # Fold batch into the lane dim (pure row-major reshapes, no transposes).
    q2 = query.reshape(T, B * D)
    k2 = key.reshape(S, B * D)
    v2 = value.reshape(S, B * D)

    kernel = functools.partial(_fused_rel_attn_kernel, B=B, H=H, D=D, DH=DH)
    out2 = pl.pallas_call(
        kernel,
        out_shape=jax.ShapeDtypeStruct((T, B * D), jnp.float32),
        scratch_shapes=[
            pltpu.VMEM((T, D), jnp.float32),   # projected Q
            pltpu.VMEM((S, D), jnp.float32),   # projected K
            pltpu.VMEM((S, D), jnp.float32),   # projected V
            pltpu.VMEM((T, D), jnp.float32),   # per-head attention outputs (head-major lanes)
        ],
    )(q2, k2, v2, w_stack, b_stack, u_flat, v_flat, R)
    return out2.reshape(T, B, D)


# ------------------------------- pure-JAX reference -----------------------------


def reference_forward(query, key, value, params, memory_length=0):
    T, B, D = query.shape
    S = key.shape[0]
    H, DH = NUM_HEADS, D // NUM_HEADS
    Q = (query.reshape(T * B, D) @ params["wq"] + params["bq"]).reshape(T, B, H, DH)
    K = (key.reshape(S * B, D) @ params["wk"] + params["bk"]).reshape(S, B, H, DH)
    V = (value.reshape(S * B, D) @ params["wv"] + params["bv"]).reshape(S, B, H, DH)
    dist = jnp.arange(S)[:, None] - jnp.arange(T)[None, :] - memory_length
    idxs = jnp.clip(dist + (MEM_LEN - 1), 0, 2 * MEM_LEN - 2)
    R = params["rel_emb"][idxs.reshape(-1)].reshape(T, S, DH)
    AC = jnp.einsum("tbhd,sbhd->bhts", Q, K)
    AP = jnp.einsum("tbhd,tsd->bhts", Q, R)
    UB = jnp.einsum("hd,sbhd->bhs", params["u"], K)[:, :, None, :]
    VB = jnp.einsum("hd,tsd->hts", params["v"], R)[None]
    scores = (AC + AP + UB + VB) / math.sqrt(DH)
    attn = jax.nn.softmax(scores, axis=-1)
    out = jnp.einsum("bhts,sbhd->tbhd", attn, V).reshape(T, B, D)
    out = out.reshape(T * B, D) @ params["wo"] + params["bo"]
    return out.reshape(T, B, D)


# ------------------------------------ main --------------------------------------


def init_params(key):
    keys = jax.random.split(key, 11)
    bound = 1.0 / math.sqrt(D_MODEL)

    def lin(kw, kb):
        w = jax.random.uniform(kw, (D_MODEL, D_MODEL), jnp.float32, -bound, bound)
        b = jax.random.uniform(kb, (1, D_MODEL), jnp.float32, -bound, bound)
        return w, b

    params = {}
    params["wq"], params["bq"] = lin(keys[0], keys[1])
    params["wk"], params["bk"] = lin(keys[2], keys[3])
    params["wv"], params["bv"] = lin(keys[4], keys[5])
    params["wo"], params["bo"] = lin(keys[6], keys[7])
    params["rel_emb"] = jax.random.normal(keys[8], (2 * MEM_LEN - 1, D_HEAD), jnp.float32)
    params["u"] = jax.random.normal(keys[9], (NUM_HEADS, D_HEAD), jnp.float32)
    params["v"] = jax.random.normal(keys[10], (NUM_HEADS, D_HEAD), jnp.float32)
    return params


if __name__ == "__main__":
    T, S, B = 8, 8, 2
    root = jax.random.PRNGKey(0)
    kp, kq, kk, kv = jax.random.split(root, 4)
    params = init_params(kp)

    query = jax.random.normal(kq, (T, B, D_MODEL), jnp.float32)
    key = jax.random.normal(kk, (S, B, D_MODEL), jnp.float32)
    value = jax.random.normal(kv, (S, B, D_MODEL), jnp.float32)

    out = rel_multihead_attention(query, key, value, params, memory_length=0)
    out = jax.block_until_ready(out)

    ref = reference_forward(query, key, value, params, memory_length=0)
    assert out.shape == (T, B, D_MODEL)
    assert jnp.allclose(out, ref, rtol=1e-3, atol=1e-3), "mismatch vs pure-JAX reference"

    print("KERNEL_OK")
</pallas_src>

<mosaic_0001>
module attributes {stable_mosaic.version = 11 : i64} {
  func.func @_fused_rel_attn_kernel(%arg0: memref<8x128xf32, #tpu.memory_space<vmem>>, %arg1: memref<8x128xf32, #tpu.memory_space<vmem>>, %arg2: memref<8x128xf32, #tpu.memory_space<vmem>>, %arg3: memref<4x64x64xf32, #tpu.memory_space<vmem>>, %arg4: memref<4x1x64xf32, #tpu.memory_space<vmem>>, %arg5: memref<1x64xf32, #tpu.memory_space<vmem>>, %arg6: memref<1x64xf32, #tpu.memory_space<vmem>>, %arg7: memref<8x8x16xf32, #tpu.memory_space<vmem>>, %arg8: memref<8x128xf32, #tpu.memory_space<vmem>>, %arg9: memref<8x64xf32, #tpu.memory_space<vmem>>, %arg10: memref<8x64xf32, #tpu.memory_space<vmem>>, %arg11: memref<8x64xf32, #tpu.memory_space<vmem>>, %arg12: memref<8x64xf32, #tpu.memory_space<vmem>>) attributes {dimension_semantics = [], scalar_prefetch = 0 : i64, scratch_operands = 4 : i64, tpu.core_type = #tpu.core_type<tc>} {
    %c0 = arith.constant 0 : index
    %c0_0 = arith.constant 0 : index
    %c0_1 = arith.constant 0 : index
    %0 = vector.load %arg7[%c0, %c0_0, %c0_1] : memref<8x8x16xf32, #tpu.memory_space<vmem>>, vector<8x8x16xf32>
    %c0_2 = arith.constant 0 : index
    %c0_3 = arith.constant 0 : index
    %c0_4 = arith.constant 0 : index
    %1 = vector.load %arg3[%c0_2, %c0_3, %c0_4] : memref<4x64x64xf32, #tpu.memory_space<vmem>>, vector<1x64x64xf32>
    %2 = vector.shape_cast %1 : vector<1x64x64xf32> to vector<64x64xf32>
    %c1 = arith.constant 1 : index
    %c0_5 = arith.constant 0 : index
    %c0_6 = arith.constant 0 : index
    %3 = vector.load %arg3[%c1, %c0_5, %c0_6] : memref<4x64x64xf32, #tpu.memory_space<vmem>>, vector<1x64x64xf32>
    %4 = vector.shape_cast %3 : vector<1x64x64xf32> to vector<64x64xf32>
    %c2 = arith.constant 2 : index
    %c0_7 = arith.constant 0 : index
    %c0_8 = arith.constant 0 : index
    %5 = vector.load %arg3[%c2, %c0_7, %c0_8] : memref<4x64x64xf32, #tpu.memory_space<vmem>>, vector<1x64x64xf32>
    %6 = vector.shape_cast %5 : vector<1x64x64xf32> to vector<64x64xf32>
    %c3 = arith.constant 3 : index
    %c0_9 = arith.constant 0 : index
    %c0_10 = arith.constant 0 : index
    %7 = vector.load %arg3[%c3, %c0_9, %c0_10] : memref<4x64x64xf32, #tpu.memory_space<vmem>>, vector<1x64x64xf32>
    %8 = vector.shape_cast %7 : vector<1x64x64xf32> to vector<64x64xf32>
    %c0_11 = arith.constant 0 : index
    %c0_12 = arith.constant 0 : index
    %c0_13 = arith.constant 0 : index
    %9 = vector.load %arg4[%c0_11, %c0_12, %c0_13] : memref<4x1x64xf32, #tpu.memory_space<vmem>>, vector<1x1x64xf32>
    %10 = vector.shape_cast %9 : vector<1x1x64xf32> to vector<1x64xf32>
    %c1_14 = arith.constant 1 : index
    %c0_15 = arith.constant 0 : index
    %c0_16 = arith.constant 0 : index
    %11 = vector.load %arg4[%c1_14, %c0_15, %c0_16] : memref<4x1x64xf32, #tpu.memory_space<vmem>>, vector<1x1x64xf32>
    %12 = vector.shape_cast %11 : vector<1x1x64xf32> to vector<1x64xf32>
    %c2_17 = arith.constant 2 : index
    %c0_18 = arith.constant 0 : index
    %c0_19 = arith.constant 0 : index
    %13 = vector.load %arg4[%c2_17, %c0_18, %c0_19] : memref<4x1x64xf32, #tpu.memory_space<vmem>>, vector<1x1x64xf32>
    %14 = vector.shape_cast %13 : vector<1x1x64xf32> to vector<1x64xf32>
    %c3_20 = arith.constant 3 : index
    %c0_21 = arith.constant 0 : index
    %c0_22 = arith.constant 0 : index
    %15 = vector.load %arg4[%c3_20, %c0_21, %c0_22] : memref<4x1x64xf32, #tpu.memory_space<vmem>>, vector<1x1x64xf32>
    %16 = vector.shape_cast %15 : vector<1x1x64xf32> to vector<1x64xf32>
    %c0_23 = arith.constant 0 : index
    %c0_24 = arith.constant 0 : index
    %17 = vector.load %arg0[%c0_23, %c0_24] : memref<8x128xf32, #tpu.memory_space<vmem>>, vector<8x64xf32>
    %cst = arith.constant dense<0.000000e+00> : vector<8x64xf32>
    %18 = tpu.matmul %17, %2, %cst {dimension_numbers = #tpu.dot_dimension_numbers<[1], [0], [0], [1], [0, 0, 1, 1], [], []>} : vector<8x64xf32>, vector<64x64xf32>, vector<8x64xf32> -> vector<8x64xf32>
    %19 = vector.broadcast %10 : vector<1x64xf32> to vector<8x64xf32>
    %20 = arith.addf %18, %19 : vector<8x64xf32>
    %c0_25 = arith.constant 0 : index
    %c0_26 = arith.constant 0 : index
    %21 = vector.load %arg9[%c0_25, %c0_26] : memref<8x64xf32, #tpu.memory_space<vmem>>, vector<8x64xf32>
    tpu.vector_store %arg9[%c0_25, %c0_26], %20 {strides = array<i32>} : memref<8x64xf32, #tpu.memory_space<vmem>>, vector<8x64xf32>,
    %c0_27 = arith.constant 0 : index
    %c0_28 = arith.constant 0 : index
    %22 = vector.load %arg1[%c0_27, %c0_28] : memref<8x128xf32, #tpu.memory_space<vmem>>, vector<8x64xf32>
    %cst_29 = arith.constant dense<0.000000e+00> : vector<8x64xf32>
    %23 = tpu.matmul %22, %4, %cst_29 {dimension_numbers = #tpu.dot_dimension_numbers<[1], [0], [0], [1], [0, 0, 1, 1], [], []>} : vector<8x64xf32>, vector<64x64xf32>, vector<8x64xf32> -> vector<8x64xf32>
    %24 = vector.broadcast %12 : vector<1x64xf32> to vector<8x64xf32>
    %25 = arith.addf %23, %24 : vector<8x64xf32>
    %c0_30 = arith.constant 0 : index
    %c0_31 = arith.constant 0 : index
    %26 = vector.load %arg10[%c0_30, %c0_31] : memref<8x64xf32, #tpu.memory_space<vmem>>, vector<8x64xf32>
    tpu.vector_store %arg10[%c0_30, %c0_31], %25 {strides = array<i32>} : memref<8x64xf32, #tpu.memory_space<vmem>>, vector<8x64xf32>,
    %c0_32 = arith.constant 0 : index
    %c0_33 = arith.constant 0 : index
    %27 = vector.load %arg2[%c0_32, %c0_33] : memref<8x128xf32, #tpu.memory_space<vmem>>, vector<8x64xf32>
    %cst_34 = arith.constant dense<0.000000e+00> : vector<8x64xf32>
    %28 = tpu.matmul %27, %6, %cst_34 {dimension_numbers = #tpu.dot_dimension_numbers<[1], [0], [0], [1], [0, 0, 1, 1], [], []>} : vector<8x64xf32>, vector<64x64xf32>, vector<8x64xf32> -> vector<8x64xf32>
    %29 = vector.broadcast %14 : vector<1x64xf32> to vector<8x64xf32>
    %30 = arith.addf %28, %29 : vector<8x64xf32>
    %c0_35 = arith.constant 0 : index
    %c0_36 = arith.constant 0 : index
    %31 = vector.load %arg11[%c0_35, %c0_36] : memref<8x64xf32, #tpu.memory_space<vmem>>, vector<8x64xf32>
    tpu.vector_store %arg11[%c0_35, %c0_36], %30 {strides = array<i32>} : memref<8x64xf32, #tpu.memory_space<vmem>>, vector<8x64xf32>,
    %c0_37 = arith.constant 0 : index
    %c0_38 = arith.constant 0 : index
    %32 = vector.load %arg9[%c0_37, %c0_38] : memref<8x64xf32, #tpu.memory_space<vmem>>, vector<8x16xf32>
    %c0_39 = arith.constant 0 : index
    %c0_40 = arith.constant 0 : index
    %33 = vector.load %arg10[%c0_39, %c0_40] : memref<8x64xf32, #tpu.memory_space<vmem>>, vector<8x16xf32>
    %c0_41 = arith.constant 0 : index
    %c0_42 = arith.constant 0 : index
    %34 = vector.load %arg11[%c0_41, %c0_42] : memref<8x64xf32, #tpu.memory_space<vmem>>, vector<8x16xf32>
    %c0_43 = arith.constant 0 : index
    %c0_44 = arith.constant 0 : index
    %35 = vector.load %arg5[%c0_43, %c0_44] : memref<1x64xf32, #tpu.memory_space<vmem>>, vector<1x16xf32>
    %36 = vector.broadcast %35 : vector<1x16xf32> to vector<8x16xf32>
    %37 = arith.addf %32, %36 : vector<8x16xf32>
    %c0_45 = arith.constant 0 : index
    %c0_46 = arith.constant 0 : index
    %38 = vector.load %arg6[%c0_45, %c0_46] : memref<1x64xf32, #tpu.memory_space<vmem>>, vector<1x16xf32>
    %39 = vector.broadcast %38 : vector<1x16xf32> to vector<8x16xf32>
    %40 = arith.addf %32, %39 : vector<8x16xf32>
    %cst_47 = arith.constant dense<0.000000e+00> : vector<8x8xf32>
    %41 = tpu.matmul %37, %33, %cst_47 {dimension_numbers = #tpu.dot_dimension_numbers<[1], [1], [0], [0], [0, 0, 1, 0], [], []>} : vector<8x16xf32>, vector<8x16xf32>, vector<8x8xf32> -> vector<8x8xf32>
    %42 = vector.shape_cast %40 : vector<8x16xf32> to vector<8x1x16xf32>
    "tpu.trace_start"() <{level = 10 : i32, message = "tqd,tsd->tqs"}> : () -> ()
    %cst_48 = arith.constant dense<0.000000e+00> : vector<8x1x8xf32>
    %43 = tpu.matmul %42, %0, %cst_48 {dimension_numbers = #tpu.dot_dimension_numbers<[2], [2], [1], [1], [0, 0, 0, 1, 1, 1], [0], [0]>} : vector<8x1x16xf32>, vector<8x8x16xf32>, vector<8x1x8xf32> -> vector<8x1x8xf32>
    "tpu.trace_stop"() : () -> ()
    %44 = vector.shape_cast %43 : vector<8x1x8xf32> to vector<8x8xf32>
    %45 = arith.addf %41, %44 : vector<8x8xf32>
    %cst_49 = arith.constant 2.500000e-01 : f32
    %46 = vector.broadcast %cst_49 : f32 to vector<8x8xf32>
    %47 = arith.mulf %45, %46 : vector<8x8xf32>
    %cst_50 = arith.constant dense<0xFF800000> : vector<8xf32>
    %48 = vector.multi_reduction <maximumf>, %47, %cst_50 [1] : vector<8x8xf32> to vector<8xf32>
    %49 = vector.shape_cast %48 : vector<8xf32> to vector<8x1xf32>
    %50 = vector.broadcast %49 : vector<8x1xf32> to vector<8x8xf32>
    %51 = arith.subf %47, %50 : vector<8x8xf32>
    %52 = math.exp %51 : vector<8x8xf32>
    %cst_51 = arith.constant dense<0.000000e+00> : vector<8xf32>
    %53 = vector.multi_reduction <add>, %52, %cst_51 [1] : vector<8x8xf32> to vector<8xf32>
    %54 = vector.shape_cast %53 : vector<8xf32> to vector<8x1xf32>
    %55 = tpu.reciprocal %54 : vector<8x1xf32> -> vector<8x1xf32>
    %cst_52 = arith.constant dense<0.000000e+00> : vector<8x16xf32>
    %56 = tpu.matmul %52, %34, %cst_52 {dimension_numbers = #tpu.dot_dimension_numbers<[1], [0], [0], [1], [0, 0, 1, 1], [], []>} : vector<8x8xf32>, vector<8x16xf32>, vector<8x16xf32> -> vector<8x16xf32>
    %57 = vector.broadcast %55 : vector<8x1xf32> to vector<8x16xf32>
    %58 = arith.mulf %56, %57 : vector<8x16xf32>
    %c0_53 = arith.constant 0 : index
    %c0_54 = arith.constant 0 : index
    %59 = vector.load %arg12[%c0_53, %c0_54] : memref<8x64xf32, #tpu.memory_space<vmem>>, vector<8x16xf32>
    tpu.vector_store %arg12[%c0_53, %c0_54], %58 {strides = array<i32>} : memref<8x64xf32, #tpu.memory_space<vmem>>, vector<8x16xf32>,
    %c0_55 = arith.constant 0 : index
    %c16 = arith.constant 16 : index
    %60 = vector.load %arg9[%c0_55, %c16] : memref<8x64xf32, #tpu.memory_space<vmem>>, vector<8x16xf32>
    %c0_56 = arith.constant 0 : index
    %c16_57 = arith.constant 16 : index
    %61 = vector.load %arg10[%c0_56, %c16_57] : memref<8x64xf32, #tpu.memory_space<vmem>>, vector<8x16xf32>
    %c0_58 = arith.constant 0 : index
    %c16_59 = arith.constant 16 : index
    %62 = vector.load %arg11[%c0_58, %c16_59] : memref<8x64xf32, #tpu.memory_space<vmem>>, vector<8x16xf32>
    %c0_60 = arith.constant 0 : index
    %c16_61 = arith.constant 16 : index
    %63 = vector.load %arg5[%c0_60, %c16_61] : memref<1x64xf32, #tpu.memory_space<vmem>>, vector<1x16xf32>
    %64 = vector.broadcast %63 : vector<1x16xf32> to vector<8x16xf32>
    %65 = arith.addf %60, %64 : vector<8x16xf32>
    %c0_62 = arith.constant 0 : index
    %c16_63 = arith.constant 16 : index
    %66 = vector.load %arg6[%c0_62, %c16_63] : memref<1x64xf32, #tpu.memory_space<vmem>>, vector<1x16xf32>
    %67 = vector.broadcast %66 : vector<1x16xf32> to vector<8x16xf32>
    %68 = arith.addf %60, %67 : vector<8x16xf32>
    %cst_64 = arith.constant dense<0.000000e+00> : vector<8x8xf32>
    %69 = tpu.matmul %65, %61, %cst_64 {dimension_numbers = #tpu.dot_dimension_numbers<[1], [1], [0], [0], [0, 0, 1, 0], [], []>} : vector<8x16xf32>, vector<8x16xf32>, vector<8x8xf32> -> vector<8x8xf32>
    %70 = vector.shape_cast %68 : vector<8x16xf32> to vector<8x1x16xf32>
    "tpu.trace_start"() <{level = 10 : i32, message = "tqd,tsd->tqs"}> : () -> ()
    %cst_65 = arith.constant dense<0.000000e+00> : vector<8x1x8xf32>
    %71 = tpu.matmul %70, %0, %cst_65 {dimension_numbers = #tpu.dot_dimension_numbers<[2], [2], [1], [1], [0, 0, 0, 1, 1, 1], [0], [0]>} : vector<8x1x16xf32>, vector<8x8x16xf32>, vector<8x1x8xf32> -> vector<8x1x8xf32>
    "tpu.trace_stop"() : () -> ()
    %72 = vector.shape_cast %71 : vector<8x1x8xf32> to vector<8x8xf32>
    %73 = arith.addf %69, %72 : vector<8x8xf32>
    %cst_66 = arith.constant 2.500000e-01 : f32
    %74 = vector.broadcast %cst_66 : f32 to vector<8x8xf32>
    %75 = arith.mulf %73, %74 : vector<8x8xf32>
    %cst_67 = arith.constant dense<0xFF800000> : vector<8xf32>
    %76 = vector.multi_reduction <maximumf>, %75, %cst_67 [1] : vector<8x8xf32> to vector<8xf32>
    %77 = vector.shape_cast %76 : vector<8xf32> to vector<8x1xf32>
    %78 = vector.broadcast %77 : vector<8x1xf32> to vector<8x8xf32>
    %79 = arith.subf %75, %78 : vector<8x8xf32>
    %80 = math.exp %79 : vector<8x8xf32>
    %cst_68 = arith.constant dense<0.000000e+00> : vector<8xf32>
    %81 = vector.multi_reduction <add>, %80, %cst_68 [1] : vector<8x8xf32> to vector<8xf32>
    %82 = vector.shape_cast %81 : vector<8xf32> to vector<8x1xf32>
    %83 = tpu.reciprocal %82 : vector<8x1xf32> -> vector<8x1xf32>
    %cst_69 = arith.constant dense<0.000000e+00> : vector<8x16xf32>
    %84 = tpu.matmul %80, %62, %cst_69 {dimension_numbers = #tpu.dot_dimension_numbers<[1], [0], [0], [1], [0, 0, 1, 1], [], []>} : vector<8x8xf32>, vector<8x16xf32>, vector<8x16xf32> -> vector<8x16xf32>
    %85 = vector.broadcast %83 : vector<8x1xf32> to vector<8x16xf32>
    %86 = arith.mulf %84, %85 : vector<8x16xf32>
    %c0_70 = arith.constant 0 : index
    %c16_71 = arith.constant 16 : index
    %87 = vector.load %arg12[%c0_70, %c16_71] : memref<8x64xf32, #tpu.memory_space<vmem>>, vector<8x16xf32>
    tpu.vector_store %arg12[%c0_70, %c16_71], %86 {strides = array<i32>} : memref<8x64xf32, #tpu.memory_space<vmem>>, vector<8x16xf32>,
    %c0_72 = arith.constant 0 : index
    %c32 = arith.constant 32 : index
    %88 = vector.load %arg9[%c0_72, %c32] : memref<8x64xf32, #tpu.memory_space<vmem>>, vector<8x16xf32>
    %c0_73 = arith.constant 0 : index
    %c32_74 = arith.constant 32 : index
    %89 = vector.load %arg10[%c0_73, %c32_74] : memref<8x64xf32, #tpu.memory_space<vmem>>, vector<8x16xf32>
    %c0_75 = arith.constant 0 : index
    %c32_76 = arith.constant 32 : index
    %90 = vector.load %arg11[%c0_75, %c32_76] : memref<8x64xf32, #tpu.memory_space<vmem>>, vector<8x16xf32>
    %c0_77 = arith.constant 0 : index
    %c32_78 = arith.constant 32 : index
    %91 = vector.load %arg5[%c0_77, %c32_78] : memref<1x64xf32, #tpu.memory_space<vmem>>, vector<1x16xf32>
    %92 = vector.broadcast %91 : vector<1x16xf32> to vector<8x16xf32>
    %93 = arith.addf %88, %92 : vector<8x16xf32>
    %c0_79 = arith.constant 0 : index
    %c32_80 = arith.constant 32 : index
    %94 = vector.load %arg6[%c0_79, %c32_80] : memref<1x64xf32, #tpu.memory_space<vmem>>, vector<1x16xf32>
    %95 = vector.broadcast %94 : vector<1x16xf32> to vector<8x16xf32>
    %96 = arith.addf %88, %95 : vector<8x16xf32>
    %cst_81 = arith.constant dense<0.000000e+00> : vector<8x8xf32>
    %97 = tpu.matmul %93, %89, %cst_81 {dimension_numbers = #tpu.dot_dimension_numbers<[1], [1], [0], [0], [0, 0, 1, 0], [], []>} : vector<8x16xf32>, vector<8x16xf32>, vector<8x8xf32> -> vector<8x8xf32>
    %98 = vector.shape_cast %96 : vector<8x16xf32> to vector<8x1x16xf32>
    "tpu.trace_start"() <{level = 10 : i32, message = "tqd,tsd->tqs"}> : () -> ()
    %cst_82 = arith.constant dense<0.000000e+00> : vector<8x1x8xf32>
    %99 = tpu.matmul %98, %0, %cst_82 {dimension_numbers = #tpu.dot_dimension_numbers<[2], [2], [1], [1], [0, 0, 0, 1, 1, 1], [0], [0]>} : vector<8x1x16xf32>, vector<8x8x16xf32>, vector<8x1x8xf32> -> vector<8x1x8xf32>
    "tpu.trace_stop"() : () -> ()
    %100 = vector.shape_cast %99 : vector<8x1x8xf32> to vector<8x8xf32>
    %101 = arith.addf %97, %100 : vector<8x8xf32>
    %cst_83 = arith.constant 2.500000e-01 : f32
    %102 = vector.broadcast %cst_83 : f32 to vector<8x8xf32>
    %103 = arith.mulf %101, %102 : vector<8x8xf32>
    %cst_84 = arith.constant dense<0xFF800000> : vector<8xf32>
    %104 = vector.multi_reduction <maximumf>, %103, %cst_84 [1] : vector<8x8xf32> to vector<8xf32>
    %105 = vector.shape_cast %104 : vector<8xf32> to vector<8x1xf32>
    %106 = vector.broadcast %105 : vector<8x1xf32> to vector<8x8xf32>
    %107 = arith.subf %103, %106 : vector<8x8xf32>
    %108 = math.exp %107 : vector<8x8xf32>
    %cst_85 = arith.constant dense<0.000000e+00> : vector<8xf32>
    %109 = vector.multi_reduction <add>, %108, %cst_85 [1] : vector<8x8xf32> to vector<8xf32>
    %110 = vector.shape_cast %109 : vector<8xf32> to vector<8x1xf32>
    %111 = tpu.reciprocal %110 : vector<8x1xf32> -> vector<8x1xf32>
    %cst_86 = arith.constant dense<0.000000e+00> : vector<8x16xf32>
    %112 = tpu.matmul %108, %90, %cst_86 {dimension_numbers = #tpu.dot_dimension_numbers<[1], [0], [0], [1], [0, 0, 1, 1], [], []>} : vector<8x8xf32>, vector<8x16xf32>, vector<8x16xf32> -> vector<8x16xf32>
    %113 = vector.broadcast %111 : vector<8x1xf32> to vector<8x16xf32>
    %114 = arith.mulf %112, %113 : vector<8x16xf32>
    %c0_87 = arith.constant 0 : index
    %c32_88 = arith.constant 32 : index
    %115 = vector.load %arg12[%c0_87, %c32_88] : memref<8x64xf32, #tpu.memory_space<vmem>>, vector<8x16xf32>
    tpu.vector_store %arg12[%c0_87, %c32_88], %114 {strides = array<i32>} : memref<8x64xf32, #tpu.memory_space<vmem>>, vector<8x16xf32>,
    %c0_89 = arith.constant 0 : index
    %c48 = arith.constant 48 : index
    %116 = vector.load %arg9[%c0_89, %c48] : memref<8x64xf32, #tpu.memory_space<vmem>>, vector<8x16xf32>
    %c0_90 = arith.constant 0 : index
    %c48_91 = arith.constant 48 : index
    %117 = vector.load %arg10[%c0_90, %c48_91] : memref<8x64xf32, #tpu.memory_space<vmem>>, vector<8x16xf32>
    %c0_92 = arith.constant 0 : index
    %c48_93 = arith.constant 48 : index
    %118 = vector.load %arg11[%c0_92, %c48_93] : memref<8x64xf32, #tpu.memory_space<vmem>>, vector<8x16xf32>
    %c0_94 = arith.constant 0 : index
    %c48_95 = arith.constant 48 : index
    %119 = vector.load %arg5[%c0_94, %c48_95] : memref<1x64xf32, #tpu.memory_space<vmem>>, vector<1x16xf32>
    %120 = vector.broadcast %119 : vector<1x16xf32> to vector<8x16xf32>
    %121 = arith.addf %116, %120 : vector<8x16xf32>
    %c0_96 = arith.constant 0 : index
    %c48_97 = arith.constant 48 : index
    %122 = vector.load %arg6[%c0_96, %c48_97] : memref<1x64xf32, #tpu.memory_space<vmem>>, vector<1x16xf32>
    %123 = vector.broadcast %122 : vector<1x16xf32> to vector<8x16xf32>
    %124 = arith.addf %116, %123 : vector<8x16xf32>
    %cst_98 = arith.constant dense<0.000000e+00> : vector<8x8xf32>
    %125 = tpu.matmul %121, %117, %cst_98 {dimension_numbers = #tpu.dot_dimension_numbers<[1], [1], [0], [0], [0, 0, 1, 0], [], []>} : vector<8x16xf32>, vector<8x16xf32>, vector<8x8xf32> -> vector<8x8xf32>
    %126 = vector.shape_cast %124 : vector<8x16xf32> to vector<8x1x16xf32>
    "tpu.trace_start"() <{level = 10 : i32, message = "tqd,tsd->tqs"}> : () -> ()
    %cst_99 = arith.constant dense<0.000000e+00> : vector<8x1x8xf32>
    %127 = tpu.matmul %126, %0, %cst_99 {dimension_numbers = #tpu.dot_dimension_numbers<[2], [2], [1], [1], [0, 0, 0, 1, 1, 1], [0], [0]>} : vector<8x1x16xf32>, vector<8x8x16xf32>, vector<8x1x8xf32> -> vector<8x1x8xf32>
    "tpu.trace_stop"() : () -> ()
    %128 = vector.shape_cast %127 : vector<8x1x8xf32> to vector<8x8xf32>
    %129 = arith.addf %125, %128 : vector<8x8xf32>
    %cst_100 = arith.constant 2.500000e-01 : f32
    %130 = vector.broadcast %cst_100 : f32 to vector<8x8xf32>
    %131 = arith.mulf %129, %130 : vector<8x8xf32>
    %cst_101 = arith.constant dense<0xFF800000> : vector<8xf32>
    %132 = vector.multi_reduction <maximumf>, %131, %cst_101 [1] : vector<8x8xf32> to vector<8xf32>
    %133 = vector.shape_cast %132 : vector<8xf32> to vector<8x1xf32>
    %134 = vector.broadcast %133 : vector<8x1xf32> to vector<8x8xf32>
    %135 = arith.subf %131, %134 : vector<8x8xf32>
    %136 = math.exp %135 : vector<8x8xf32>
    %cst_102 = arith.constant dense<0.000000e+00> : vector<8xf32>
    %137 = vector.multi_reduction <add>, %136, %cst_102 [1] : vector<8x8xf32> to vector<8xf32>
    %138 = vector.shape_cast %137 : vector<8xf32> to vector<8x1xf32>
    %139 = tpu.reciprocal %138 : vector<8x1xf32> -> vector<8x1xf32>
    %cst_103 = arith.constant dense<0.000000e+00> : vector<8x16xf32>
    %140 = tpu.matmul %136, %118, %cst_103 {dimension_numbers = #tpu.dot_dimension_numbers<[1], [0], [0], [1], [0, 0, 1, 1], [], []>} : vector<8x8xf32>, vector<8x16xf32>, vector<8x16xf32> -> vector<8x16xf32>
    %141 = vector.broadcast %139 : vector<8x1xf32> to vector<8x16xf32>
    %142 = arith.mulf %140, %141 : vector<8x16xf32>
    %c0_104 = arith.constant 0 : index
    %c48_105 = arith.constant 48 : index
    %143 = vector.load %arg12[%c0_104, %c48_105] : memref<8x64xf32, #tpu.memory_space<vmem>>, vector<8x16xf32>
    tpu.vector_store %arg12[%c0_104, %c48_105], %142 {strides = array<i32>} : memref<8x64xf32, #tpu.memory_space<vmem>>, vector<8x16xf32>,
    %c0_106 = arith.constant 0 : index
    %c0_107 = arith.constant 0 : index
    %144 = vector.load %arg12[%c0_106, %c0_107] : memref<8x64xf32, #tpu.memory_space<vmem>>, vector<8x64xf32>
    %cst_108 = arith.constant dense<0.000000e+00> : vector<8x64xf32>
    %145 = tpu.matmul %144, %8, %cst_108 {dimension_numbers = #tpu.dot_dimension_numbers<[1], [0], [0], [1], [0, 0, 1, 1], [], []>} : vector<8x64xf32>, vector<64x64xf32>, vector<8x64xf32> -> vector<8x64xf32>
    %146 = vector.broadcast %16 : vector<1x64xf32> to vector<8x64xf32>
    %147 = arith.addf %145, %146 : vector<8x64xf32>
    %c0_109 = arith.constant 0 : index
    %c0_110 = arith.constant 0 : index
    %148 = vector.load %arg8[%c0_109, %c0_110] : memref<8x128xf32, #tpu.memory_space<vmem>>, vector<8x64xf32>
    tpu.vector_store %arg8[%c0_109, %c0_110], %147 {strides = array<i32>} : memref<8x128xf32, #tpu.memory_space<vmem>>, vector<8x64xf32>,
    %c0_111 = arith.constant 0 : index
    %c64 = arith.constant 64 : index
    %149 = vector.load %arg0[%c0_111, %c64] : memref<8x128xf32, #tpu.memory_space<vmem>>, vector<8x64xf32>
    %cst_112 = arith.constant dense<0.000000e+00> : vector<8x64xf32>
    %150 = tpu.matmul %149, %2, %cst_112 {dimension_numbers = #tpu.dot_dimension_numbers<[1], [0], [0], [1], [0, 0, 1, 1], [], []>} : vector<8x64xf32>, vector<64x64xf32>, vector<8x64xf32> -> vector<8x64xf32>
    %151 = vector.broadcast %10 : vector<1x64xf32> to vector<8x64xf32>
    %152 = arith.addf %150, %151 : vector<8x64xf32>
    %c0_113 = arith.constant 0 : index
    %c0_114 = arith.constant 0 : index
    %153 = vector.load %arg9[%c0_113, %c0_114] : memref<8x64xf32, #tpu.memory_space<vmem>>, vector<8x64xf32>
    tpu.vector_store %arg9[%c0_113, %c0_114], %152 {strides = array<i32>} : memref<8x64xf32, #tpu.memory_space<vmem>>, vector<8x64xf32>,
    %c0_115 = arith.constant 0 : index
    %c64_116 = arith.constant 64 : index
    %154 = vector.load %arg1[%c0_115, %c64_116] : memref<8x128xf32, #tpu.memory_space<vmem>>, vector<8x64xf32>
    %cst_117 = arith.constant dense<0.000000e+00> : vector<8x64xf32>
    %155 = tpu.matmul %154, %4, %cst_117 {dimension_numbers = #tpu.dot_dimension_numbers<[1], [0], [0], [1], [0, 0, 1, 1], [], []>} : vector<8x64xf32>, vector<64x64xf32>, vector<8x64xf32> -> vector<8x64xf32>
    %156 = vector.broadcast %12 : vector<1x64xf32> to vector<8x64xf32>
    %157 = arith.addf %155, %156 : vector<8x64xf32>
    %c0_118 = arith.constant 0 : index
    %c0_119 = arith.constant 0 : index
    %158 = vector.load %arg10[%c0_118, %c0_119] : memref<8x64xf32, #tpu.memory_space<vmem>>, vector<8x64xf32>
    tpu.vector_store %arg10[%c0_118, %c0_119], %157 {strides = array<i32>} : memref<8x64xf32, #tpu.memory_space<vmem>>, vector<8x64xf32>,
    %c0_120 = arith.constant 0 : index
    %c64_121 = arith.constant 64 : index
    %159 = vector.load %arg2[%c0_120, %c64_121] : memref<8x128xf32, #tpu.memory_space<vmem>>, vector<8x64xf32>
    %cst_122 = arith.constant dense<0.000000e+00> : vector<8x64xf32>
    %160 = tpu.matmul %159, %6, %cst_122 {dimension_numbers = #tpu.dot_dimension_numbers<[1], [0], [0], [1], [0, 0, 1, 1], [], []>} : vector<8x64xf32>, vector<64x64xf32>, vector<8x64xf32> -> vector<8x64xf32>
    %161 = vector.broadcast %14 : vector<1x64xf32> to vector<8x64xf32>
    %162 = arith.addf %160, %161 : vector<8x64xf32>
    %c0_123 = arith.constant 0 : index
    %c0_124 = arith.constant 0 : index
    %163 = vector.load %arg11[%c0_123, %c0_124] : memref<8x64xf32, #tpu.memory_space<vmem>>, vector<8x64xf32>
    tpu.vector_store %arg11[%c0_123, %c0_124], %162 {strides = array<i32>} : memref<8x64xf32, #tpu.memory_space<vmem>>, vector<8x64xf32>,
    %c0_125 = arith.constant 0 : index
    %c0_126 = arith.constant 0 : index
    %164 = vector.load %arg9[%c0_125, %c0_126] : memref<8x64xf32, #tpu.memory_space<vmem>>, vector<8x16xf32>
    %c0_127 = arith.constant 0 : index
    %c0_128 = arith.constant 0 : index
    %165 = vector.load %arg10[%c0_127, %c0_128] : memref<8x64xf32, #tpu.memory_space<vmem>>, vector<8x16xf32>
    %c0_129 = arith.constant 0 : index
    %c0_130 = arith.constant 0 : index
    %166 = vector.load %arg11[%c0_129, %c0_130] : memref<8x64xf32, #tpu.memory_space<vmem>>, vector<8x16xf32>
    %c0_131 = arith.constant 0 : index
    %c0_132 = arith.constant 0 : index
    %167 = vector.load %arg5[%c0_131, %c0_132] : memref<1x64xf32, #tpu.memory_space<vmem>>, vector<1x16xf32>
    %168 = vector.broadcast %167 : vector<1x16xf32> to vector<8x16xf32>
    %169 = arith.addf %164, %168 : vector<8x16xf32>
    %c0_133 = arith.constant 0 : index
    %c0_134 = arith.constant 0 : index
    %170 = vector.load %arg6[%c0_133, %c0_134] : memref<1x64xf32, #tpu.memory_space<vmem>>, vector<1x16xf32>
    %171 = vector.broadcast %170 : vector<1x16xf32> to vector<8x16xf32>
    %172 = arith.addf %164, %171 : vector<8x16xf32>
    %cst_135 = arith.constant dense<0.000000e+00> : vector<8x8xf32>
    %173 = tpu.matmul %169, %165, %cst_135 {dimension_numbers = #tpu.dot_dimension_numbers<[1], [1], [0], [0], [0, 0, 1, 0], [], []>} : vector<8x16xf32>, vector<8x16xf32>, vector<8x8xf32> -> vector<8x8xf32>
    %174 = vector.shape_cast %172 : vector<8x16xf32> to vector<8x1x16xf32>
    "tpu.trace_start"() <{level = 10 : i32, message = "tqd,tsd->tqs"}> : () -> ()
    %cst_136 = arith.constant dense<0.000000e+00> : vector<8x1x8xf32>
    %175 = tpu.matmul %174, %0, %cst_136 {dimension_numbers = #tpu.dot_dimension_numbers<[2], [2], [1], [1], [0, 0, 0, 1, 1, 1], [0], [0]>} : vector<8x1x16xf32>, vector<8x8x16xf32>, vector<8x1x8xf32> -> vector<8x1x8xf32>
    "tpu.trace_stop"() : () -> ()
    %176 = vector.shape_cast %175 : vector<8x1x8xf32> to vector<8x8xf32>
    %177 = arith.addf %173, %176 : vector<8x8xf32>
    %cst_137 = arith.constant 2.500000e-01 : f32
    %178 = vector.broadcast %cst_137 : f32 to vector<8x8xf32>
    %179 = arith.mulf %177, %178 : vector<8x8xf32>
    %cst_138 = arith.constant dense<0xFF800000> : vector<8xf32>
    %180 = vector.multi_reduction <maximumf>, %179, %cst_138 [1] : vector<8x8xf32> to vector<8xf32>
    %181 = vector.shape_cast %180 : vector<8xf32> to vector<8x1xf32>
    %182 = vector.broadcast %181 : vector<8x1xf32> to vector<8x8xf32>
    %183 = arith.subf %179, %182 : vector<8x8xf32>
    %184 = math.exp %183 : vector<8x8xf32>
    %cst_139 = arith.constant dense<0.000000e+00> : vector<8xf32>
    %185 = vector.multi_reduction <add>, %184, %cst_139 [1] : vector<8x8xf32> to vector<8xf32>
    %186 = vector.shape_cast %185 : vector<8xf32> to vector<8x1xf32>
    %187 = tpu.reciprocal %186 : vector<8x1xf32> -> vector<8x1xf32>
    %cst_140 = arith.constant dense<0.000000e+00> : vector<8x16xf32>
    %188 = tpu.matmul %184, %166, %cst_140 {dimension_numbers = #tpu.dot_dimension_numbers<[1], [0], [0], [1], [0, 0, 1, 1], [], []>} : vector<8x8xf32>, vector<8x16xf32>, vector<8x16xf32> -> vector<8x16xf32>
    %189 = vector.broadcast %187 : vector<8x1xf32> to vector<8x16xf32>
    %190 = arith.mulf %188, %189 : vector<8x16xf32>
    %c0_141 = arith.constant 0 : index
    %c0_142 = arith.constant 0 : index
    %191 = vector.load %arg12[%c0_141, %c0_142] : memref<8x64xf32, #tpu.memory_space<vmem>>, vector<8x16xf32>
    tpu.vector_store %arg12[%c0_141, %c0_142], %190 {strides = array<i32>} : memref<8x64xf32, #tpu.memory_space<vmem>>, vector<8x16xf32>,
    %c0_143 = arith.constant 0 : index
    %c16_144 = arith.constant 16 : index
    %192 = vector.load %arg9[%c0_143, %c16_144] : memref<8x64xf32, #tpu.memory_space<vmem>>, vector<8x16xf32>
    %c0_145 = arith.constant 0 : index
    %c16_146 = arith.constant 16 : index
    %193 = vector.load %arg10[%c0_145, %c16_146] : memref<8x64xf32, #tpu.memory_space<vmem>>, vector<8x16xf32>
    %c0_147 = arith.constant 0 : index
    %c16_148 = arith.constant 16 : index
    %194 = vector.load %arg11[%c0_147, %c16_148] : memref<8x64xf32, #tpu.memory_space<vmem>>, vector<8x16xf32>
    %c0_149 = arith.constant 0 : index
    %c16_150 = arith.constant 16 : index
    %195 = vector.load %arg5[%c0_149, %c16_150] : memref<1x64xf32, #tpu.memory_space<vmem>>, vector<1x16xf32>
    %196 = vector.broadcast %195 : vector<1x16xf32> to vector<8x16xf32>
    %197 = arith.addf %192, %196 : vector<8x16xf32>
    %c0_151 = arith.constant 0 : index
    %c16_152 = arith.constant 16 : index
    %198 = vector.load %arg6[%c0_151, %c16_152] : memref<1x64xf32, #tpu.memory_space<vmem>>, vector<1x16xf32>
    %199 = vector.broadcast %198 : vector<1x16xf32> to vector<8x16xf32>
    %200 = arith.addf %192, %199 : vector<8x16xf32>
    %cst_153 = arith.constant dense<0.000000e+00> : vector<8x8xf32>
    %201 = tpu.matmul %197, %193, %cst_153 {dimension_numbers = #tpu.dot_dimension_numbers<[1], [1], [0], [0], [0, 0, 1, 0], [], []>} : vector<8x16xf32>, vector<8x16xf32>, vector<8x8xf32> -> vector<8x8xf32>
    %202 = vector.shape_cast %200 : vector<8x16xf32> to vector<8x1x16xf32>
    "tpu.trace_start"() <{level = 10 : i32, message = "tqd,tsd->tqs"}> : () -> ()
    %cst_154 = arith.constant dense<0.000000e+00> : vector<8x1x8xf32>
    %203 = tpu.matmul %202, %0, %cst_154 {dimension_numbers = #tpu.dot_dimension_numbers<[2], [2], [1], [1], [0, 0, 0, 1, 1, 1], [0], [0]>} : vector<8x1x16xf32>, vector<8x8x16xf32>, vector<8x1x8xf32> -> vector<8x1x8xf32>
    "tpu.trace_stop"() : () -> ()
    %204 = vector.shape_cast %203 : vector<8x1x8xf32> to vector<8x8xf32>
    %205 = arith.addf %201, %204 : vector<8x8xf32>
    %cst_155 = arith.constant 2.500000e-01 : f32
    %206 = vector.broadcast %cst_155 : f32 to vector<8x8xf32>
    %207 = arith.mulf %205, %206 : vector<8x8xf32>
    %cst_156 = arith.constant dense<0xFF800000> : vector<8xf32>
    %208 = vector.multi_reduction <maximumf>, %207, %cst_156 [1] : vector<8x8xf32> to vector<8xf32>
    %209 = vector.shape_cast %208 : vector<8xf32> to vector<8x1xf32>
    %210 = vector.broadcast %209 : vector<8x1xf32> to vector<8x8xf32>
    %211 = arith.subf %207, %210 : vector<8x8xf32>
    %212 = math.exp %211 : vector<8x8xf32>
    %cst_157 = arith.constant dense<0.000000e+00> : vector<8xf32>
    %213 = vector.multi_reduction <add>, %212, %cst_157 [1] : vector<8x8xf32> to vector<8xf32>
    %214 = vector.shape_cast %213 : vector<8xf32> to vector<8x1xf32>
    %215 = tpu.reciprocal %214 : vector<8x1xf32> -> vector<8x1xf32>
    %cst_158 = arith.constant dense<0.000000e+00> : vector<8x16xf32>
    %216 = tpu.matmul %212, %194, %cst_158 {dimension_numbers = #tpu.dot_dimension_numbers<[1], [0], [0], [1], [0, 0, 1, 1], [], []>} : vector<8x8xf32>, vector<8x16xf32>, vector<8x16xf32> -> vector<8x16xf32>
    %217 = vector.broadcast %215 : vector<8x1xf32> to vector<8x16xf32>
    %218 = arith.mulf %216, %217 : vector<8x16xf32>
    %c0_159 = arith.constant 0 : index
    %c16_160 = arith.constant 16 : index
    %219 = vector.load %arg12[%c0_159, %c16_160] : memref<8x64xf32, #tpu.memory_space<vmem>>, vector<8x16xf32>
    tpu.vector_store %arg12[%c0_159, %c16_160], %218 {strides = array<i32>} : memref<8x64xf32, #tpu.memory_space<vmem>>, vector<8x16xf32>,
    %c0_161 = arith.constant 0 : index
    %c32_162 = arith.constant 32 : index
    %220 = vector.load %arg9[%c0_161, %c32_162] : memref<8x64xf32, #tpu.memory_space<vmem>>, vector<8x16xf32>
    %c0_163 = arith.constant 0 : index
    %c32_164 = arith.constant 32 : index
    %221 = vector.load %arg10[%c0_163, %c32_164] : memref<8x64xf32, #tpu.memory_space<vmem>>, vector<8x16xf32>
    %c0_165 = arith.constant 0 : index
    %c32_166 = arith.constant 32 : index
    %222 = vector.load %arg11[%c0_165, %c32_166] : memref<8x64xf32, #tpu.memory_space<vmem>>, vector<8x16xf32>
    %c0_167 = arith.constant 0 : index
    %c32_168 = arith.constant 32 : index
    %223 = vector.load %arg5[%c0_167, %c32_168] : memref<1x64xf32, #tpu.memory_space<vmem>>, vector<1x16xf32>
    %224 = vector.broadcast %223 : vector<1x16xf32> to vector<8x16xf32>
    %225 = arith.addf %220, %224 : vector<8x16xf32>
    %c0_169 = arith.constant 0 : index
    %c32_170 = arith.constant 32 : index
    %226 = vector.load %arg6[%c0_169, %c32_170] : memref<1x64xf32, #tpu.memory_space<vmem>>, vector<1x16xf32>
    %227 = vector.broadcast %226 : vector<1x16xf32> to vector<8x16xf32>
    %228 = arith.addf %220, %227 : vector<8x16xf32>
    %cst_171 = arith.constant dense<0.000000e+00> : vector<8x8xf32>
    %229 = tpu.matmul %225, %221, %cst_171 {dimension_numbers = #tpu.dot_dimension_numbers<[1], [1], [0], [0], [0, 0, 1, 0], [], []>} : vector<8x16xf32>, vector<8x16xf32>, vector<8x8xf32> -> vector<8x8xf32>
    %230 = vector.shape_cast %228 : vector<8x16xf32> to vector<8x1x16xf32>
    "tpu.trace_start"() <{level = 10 : i32, message = "tqd,tsd->tqs"}> : () -> ()
    %cst_172 = arith.constant dense<0.000000e+00> : vector<8x1x8xf32>
    %231 = tpu.matmul %230, %0, %cst_172 {dimension_numbers = #tpu.dot_dimension_numbers<[2], [2], [1], [1], [0, 0, 0, 1, 1, 1], [0], [0]>} : vector<8x1x16xf32>, vector<8x8x16xf32>, vector<8x1x8xf32> -> vector<8x1x8xf32>
    "tpu.trace_stop"() : () -> ()
    %232 = vector.shape_cast %231 : vector<8x1x8xf32> to vector<8x8xf32>
    %233 = arith.addf %229, %232 : vector<8x8xf32>
    %cst_173 = arith.constant 2.500000e-01 : f32
    %234 = vector.broadcast %cst_173 : f32 to vector<8x8xf32>
    %235 = arith.mulf %233, %234 : vector<8x8xf32>
    %cst_174 = arith.constant dense<0xFF800000> : vector<8xf32>
    %236 = vector.multi_reduction <maximumf>, %235, %cst_174 [1] : vector<8x8xf32> to vector<8xf32>
    %237 = vector.shape_cast %236 : vector<8xf32> to vector<8x1xf32>
    %238 = vector.broadcast %237 : vector<8x1xf32> to vector<8x8xf32>
    %239 = arith.subf %235, %238 : vector<8x8xf32>
    %240 = math.exp %239 : vector<8x8xf32>
    %cst_175 = arith.constant dense<0.000000e+00> : vector<8xf32>
    %241 = vector.multi_reduction <add>, %240, %cst_175 [1] : vector<8x8xf32> to vector<8xf32>
    %242 = vector.shape_cast %241 : vector<8xf32> to vector<8x1xf32>
    %243 = tpu.reciprocal %242 : vector<8x1xf32> -> vector<8x1xf32>
    %cst_176 = arith.constant dense<0.000000e+00> : vector<8x16xf32>
    %244 = tpu.matmul %240, %222, %cst_176 {dimension_numbers = #tpu.dot_dimension_numbers<[1], [0], [0], [1], [0, 0, 1, 1], [], []>} : vector<8x8xf32>, vector<8x16xf32>, vector<8x16xf32> -> vector<8x16xf32>
    %245 = vector.broadcast %243 : vector<8x1xf32> to vector<8x16xf32>
    %246 = arith.mulf %244, %245 : vector<8x16xf32>
    %c0_177 = arith.constant 0 : index
    %c32_178 = arith.constant 32 : index
    %247 = vector.load %arg12[%c0_177, %c32_178] : memref<8x64xf32, #tpu.memory_space<vmem>>, vector<8x16xf32>
    tpu.vector_store %arg12[%c0_177, %c32_178], %246 {strides = array<i32>} : memref<8x64xf32, #tpu.memory_space<vmem>>, vector<8x16xf32>,
    %c0_179 = arith.constant 0 : index
    %c48_180 = arith.constant 48 : index
    %248 = vector.load %arg9[%c0_179, %c48_180] : memref<8x64xf32, #tpu.memory_space<vmem>>, vector<8x16xf32>
    %c0_181 = arith.constant 0 : index
    %c48_182 = arith.constant 48 : index
    %249 = vector.load %arg10[%c0_181, %c48_182] : memref<8x64xf32, #tpu.memory_space<vmem>>, vector<8x16xf32>
    %c0_183 = arith.constant 0 : index
    %c48_184 = arith.constant 48 : index
    %250 = vector.load %arg11[%c0_183, %c48_184] : memref<8x64xf32, #tpu.memory_space<vmem>>, vector<8x16xf32>
    %c0_185 = arith.constant 0 : index
    %c48_186 = arith.constant 48 : index
    %251 = vector.load %arg5[%c0_185, %c48_186] : memref<1x64xf32, #tpu.memory_space<vmem>>, vector<1x16xf32>
    %252 = vector.broadcast %251 : vector<1x16xf32> to vector<8x16xf32>
    %253 = arith.addf %248, %252 : vector<8x16xf32>
    %c0_187 = arith.constant 0 : index
    %c48_188 = arith.constant 48 : index
    %254 = vector.load %arg6[%c0_187, %c48_188] : memref<1x64xf32, #tpu.memory_space<vmem>>, vector<1x16xf32>
    %255 = vector.broadcast %254 : vector<1x16xf32> to vector<8x16xf32>
    %256 = arith.addf %248, %255 : vector<8x16xf32>
    %cst_189 = arith.constant dense<0.000000e+00> : vector<8x8xf32>
    %257 = tpu.matmul %253, %249, %cst_189 {dimension_numbers = #tpu.dot_dimension_numbers<[1], [1], [0], [0], [0, 0, 1, 0], [], []>} : vector<8x16xf32>, vector<8x16xf32>, vector<8x8xf32> -> vector<8x8xf32>
    %258 = vector.shape_cast %256 : vector<8x16xf32> to vector<8x1x16xf32>
    "tpu.trace_start"() <{level = 10 : i32, message = "tqd,tsd->tqs"}> : () -> ()
    %cst_190 = arith.constant dense<0.000000e+00> : vector<8x1x8xf32>
    %259 = tpu.matmul %258, %0, %cst_190 {dimension_numbers = #tpu.dot_dimension_numbers<[2], [2], [1], [1], [0, 0, 0, 1, 1, 1], [0], [0]>} : vector<8x1x16xf32>, vector<8x8x16xf32>, vector<8x1x8xf32> -> vector<8x1x8xf32>
    "tpu.trace_stop"() : () -> ()
    %260 = vector.shape_cast %259 : vector<8x1x8xf32> to vector<8x8xf32>
    %261 = arith.addf %257, %260 : vector<8x8xf32>
    %cst_191 = arith.constant 2.500000e-01 : f32
    %262 = vector.broadcast %cst_191 : f32 to vector<8x8xf32>
    %263 = arith.mulf %261, %262 : vector<8x8xf32>
    %cst_192 = arith.constant dense<0xFF800000> : vector<8xf32>
    %264 = vector.multi_reduction <maximumf>, %263, %cst_192 [1] : vector<8x8xf32> to vector<8xf32>
    %265 = vector.shape_cast %264 : vector<8xf32> to vector<8x1xf32>
    %266 = vector.broadcast %265 : vector<8x1xf32> to vector<8x8xf32>
    %267 = arith.subf %263, %266 : vector<8x8xf32>
    %268 = math.exp %267 : vector<8x8xf32>
    %cst_193 = arith.constant dense<0.000000e+00> : vector<8xf32>
    %269 = vector.multi_reduction <add>, %268, %cst_193 [1] : vector<8x8xf32> to vector<8xf32>
    %270 = vector.shape_cast %269 : vector<8xf32> to vector<8x1xf32>
    %271 = tpu.reciprocal %270 : vector<8x1xf32> -> vector<8x1xf32>
    %cst_194 = arith.constant dense<0.000000e+00> : vector<8x16xf32>
    %272 = tpu.matmul %268, %250, %cst_194 {dimension_numbers = #tpu.dot_dimension_numbers<[1], [0], [0], [1], [0, 0, 1, 1], [], []>} : vector<8x8xf32>, vector<8x16xf32>, vector<8x16xf32> -> vector<8x16xf32>
    %273 = vector.broadcast %271 : vector<8x1xf32> to vector<8x16xf32>
    %274 = arith.mulf %272, %273 : vector<8x16xf32>
    %c0_195 = arith.constant 0 : index
    %c48_196 = arith.constant 48 : index
    %275 = vector.load %arg12[%c0_195, %c48_196] : memref<8x64xf32, #tpu.memory_space<vmem>>, vector<8x16xf32>
    tpu.vector_store %arg12[%c0_195, %c48_196], %274 {strides = array<i32>} : memref<8x64xf32, #tpu.memory_space<vmem>>, vector<8x16xf32>,
    %c0_197 = arith.constant 0 : index
    %c0_198 = arith.constant 0 : index
    %276 = vector.load %arg12[%c0_197, %c0_198] : memref<8x64xf32, #tpu.memory_space<vmem>>, vector<8x64xf32>
    %cst_199 = arith.constant dense<0.000000e+00> : vector<8x64xf32>
    %277 = tpu.matmul %276, %8, %cst_199 {dimension_numbers = #tpu.dot_dimension_numbers<[1], [0], [0], [1], [0, 0, 1, 1], [], []>} : vector<8x64xf32>, vector<64x64xf32>, vector<8x64xf32> -> vector<8x64xf32>
    %278 = vector.broadcast %16 : vector<1x64xf32> to vector<8x64xf32>
    %279 = arith.addf %277, %278 : vector<8x64xf32>
    %c0_200 = arith.constant 0 : index
    %c64_201 = arith.constant 64 : index
    %280 = vector.load %arg8[%c0_200, %c64_201] : memref<8x128xf32, #tpu.memory_space<vmem>>, vector<8x64xf32>
    tpu.vector_store %arg8[%c0_200, %c64_201], %279 {strides = array<i32>} : memref<8x128xf32, #tpu.memory_space<vmem>>, vector<8x64xf32>,
    return
  }
}

</mosaic_0001>

<bundles_post_ra>
// kernel: tpu_custom_call.1
= control target key start
LH: loop header
LB: loop body
LE: loop exit
PB: predicated region body
PF: predicated region fallthrough
CT: control target
= control target key end

     0   :  { %13 = vsyncpa [#allocation7], 0  ;;  %s10340_s0 = inlined_call_operand.hbm [shape: f32[8,128], index: 0, kind: input, shape index: {}]   ;;  %s10341_s1 = inlined_call_operand.hbm [shape: f32[8,128], index: 1, kind: input, shape index: {}]   ;;  %s10342_s2 = inlined_call_operand.hbm [shape: f32[8,128], index: 2, kind: input, shape index: {}]   ;;  %s10343_s3 = inlined_call_operand.hbm [shape: f32[4,64,64], index: 3, kind: input, shape index: {}]   ;;  %s10344_s4 = inlined_call_operand.vmem [shape: f32[4,1,64], index: 4, kind: input, shape index: {}]   ;;  %s10345_s5 = inlined_call_operand.vmem [shape: f32[1,64], index: 5, kind: input, shape index: {}]   ;;  %s10346_s6 = inlined_call_operand.vmem [shape: f32[1,64], index: 6, kind: input, shape index: {}]   ;;  %s10347_s7 = inlined_call_operand.hbm [shape: f32[8,8,16], index: 7, kind: input, shape index: {}]   ;;  %s10348_s8 = inlined_call_operand.hbm [shape: f32[8,128], index: 8, kind: output, shape index: {}]  }
   0x1   :  { %14 = vsyncpa [#allocation10], 0 }
   0x2   :  { %15 = vsyncpa [#allocation13], 0 }
   0x3   :  { %16 = vsyncpa [#allocation8], 0  ;;  %s9096_s27 = smov [#allocation9]   ;;  %s9097_s29 = smov [#allocation12]  }
   0x4   :  { %s33_s28 = sshll.u32 %s9096_s27, 4  ;;  %s52_s30 = sshll.u32 %s9097_s29, 4  ;;  %s34_s28 = int_to_ptr.vmem [resolvable:$true] %s33_s28  ;;  %s9160_s30 = int_to_ptr.vmem [resolvable:$true] %s52_s30 }
   0x5   :  { %s8956_s11 = scalar_lea.hbm %s10341_s1, 128 }
   0x6   :  { %p8957_p0 = scmp.ne.s32.totalorder %s10341_s1, %s8956_s11  ;;  %p8960_p1 = scmp.lt.u32.totalorder %s8956_s11, %s10341_s1 }
   0x8   :  { %p8962_p2 = pnand %p8960_p1, %p8957_p0 }
   0xa   :  { %8965 = shalt.err (!%p8962_p2)
}
   0xb   :  { %s8966_s16 = scalar_lea.vmem %s34_s28, 128  ;;  %p8971_p4 = scmp.lt.s32.totalorder %s34_s28, %s34_s28 }
   0xc   :  { %p8967_p3 = scmp.ne.s32.totalorder %s34_s28, %s8966_s16  ;;  %p8972_p5 = scmp.lt.s32.totalorder %s8966_s16, %s8966_s16 }
   0xe   :  { %p8973_p6 = por %p8972_p5, %p8971_p4 }
  0x10   :  { %p8974_p7 = pnand %p8973_p6, %p8967_p3 }
  0x12   :  { %8977 = shalt.err (!%p8974_p7)
}
  0x13   :  { %36 = dma.hbm_to_vmem [thread:$0]  %s10341_s1, 128, %s34_s28, [#allocation10]  }
  0x14   :  { %s8978_s21 = scalar_lea.hbm %s10343_s3, 4096 }
  0x15   :  { %p8979_p8 = scmp.ne.s32.totalorder %s10343_s3, %s8978_s21  ;;  %p8982_p9 = scmp.lt.u32.totalorder %s8978_s21, %s10343_s3 }
  0x17   :  { %p8984_p10 = pnand %p8982_p9, %p8979_p8 }
  0x19   :  { %8987 = shalt.err (!%p8984_p10)
}
  0x1a   :  { %s8988_s26 = scalar_lea.vmem %s9160_s30, 4096  ;;  %p8993_p12 = scmp.lt.s32.totalorder %s9160_s30, %s9160_s30 }
  0x1b   :  { %p8989_p11 = scmp.ne.s32.totalorder %s9160_s30, %s8988_s26  ;;  %p8994_p13 = scmp.lt.s32.totalorder %s8988_s26, %s8988_s26 }
  0x1d   :  { %p8995_p0 = por %p8994_p13, %p8993_p12 }
  0x1f   :  { %p8996_p1 = pnand %p8995_p0, %p8989_p11 }
  0x21   :  { %8999 = shalt.err (!%p8996_p1)
}
  0x22   :  { %s9098_s1 = smov 128   ;;  %s9099_s27 = smov 8  }
  0x23   :  { %58 = dma.hbm_to_vmem [thread:$0]  %s10343_s3, 4096, %s9160_s30, [#allocation13], %s9098_s1, %s9098_s1, %s9099_s27  }
  0x24   :  { %s9100_s9 = smov [#allocation6]   ;;  %s9101_s11 = smov [#allocation11]  }
  0x25   :  { %s23_s10 = sshll.u32 %s9100_s9, 4  ;;  %s43_s12 = sshll.u32 %s9101_s11, 4  ;;  %s24_s10 = int_to_ptr.vmem [resolvable:$true] %s23_s10  ;;  %s44_s12 = int_to_ptr.vmem [resolvable:$true] %s43_s12 }
  0x26   :  { %s9000_s15 = scalar_lea.hbm %s10340_s0, 128 }
  0x27   :  { %p9001_p2 = scmp.ne.s32.totalorder %s10340_s0, %s9000_s15  ;;  %p9004_p3 = scmp.lt.u32.totalorder %s9000_s15, %s10340_s0 }
  0x29   :  { %p9006_p4 = pnand %p9004_p3, %p9001_p2 }
  0x2b   :  { %9009 = shalt.err (!%p9006_p4)
}
  0x2c   :  { %s9010_s3 = scalar_lea.vmem %s24_s10, 128  ;;  %p9015_p6 = scmp.lt.s32.totalorder %s24_s10, %s24_s10 }
  0x2d   :  { %p9011_p5 = scmp.ne.s32.totalorder %s24_s10, %s9010_s3  ;;  %p9016_p7 = scmp.lt.s32.totalorder %s9010_s3, %s9010_s3 }
  0x2f   :  { %p9017_p8 = por %p9016_p7, %p9015_p6 }
  0x31   :  { %p9018_p9 = pnand %p9017_p8, %p9011_p5 }
  0x33   :  { %9021 = shalt.err (!%p9018_p9)
}
  0x34   :  { %26 = dma.hbm_to_vmem [thread:$0]  %s10340_s0, 128, %s24_s10, [#allocation7]  }
  0x35   :  { %s9022_s23 = scalar_lea.hbm %s10342_s2, 128 }
  0x36   :  { %p9023_p10 = scmp.ne.s32.totalorder %s10342_s2, %s9022_s23  ;;  %p9026_p11 = scmp.lt.u32.totalorder %s9022_s23, %s10342_s2 }
  0x38   :  { %p9028_p12 = pnand %p9026_p11, %p9023_p10 }
  0x3a   :  { %9031 = shalt.err (!%p9028_p12)
}
  0x3b   :  { %s9032_s29 = scalar_lea.vmem %s44_s12, 128  ;;  %p9037_p0 = scmp.lt.s32.totalorder %s44_s12, %s44_s12 }
  0x3c   :  { %p9033_p13 = scmp.ne.s32.totalorder %s44_s12, %s9032_s29  ;;  %p9038_p1 = scmp.lt.s32.totalorder %s9032_s29, %s9032_s29 }
  0x3e   :  { %p9039_p2 = por %p9038_p1, %p9037_p0 }
  0x40   :  { %p9040_p3 = pnand %p9039_p2, %p9033_p13 }
  0x42   :  { %9043 = shalt.err (!%p9040_p3)
}
  0x43   :  { %46 = dma.hbm_to_vmem [thread:$0]  %s10342_s2, 128, %s44_s12, [#allocation10]  }
  0x44   :  { %s9102_s10 = smov [#allocation14]   ;;  %s9044_s15 = scalar_lea.hbm %s10347_s7, 1024 }
  0x45   :  { %s70_s11 = sshll.u32 %s9102_s10, 4  ;;  %p9045_p4 = scmp.ne.s32.totalorder %s10347_s7, %s9044_s15  ;;  %s71_s11 = int_to_ptr.vmem [resolvable:$true] %s70_s11 }
  0x46   :  { %p9048_p5 = scmp.lt.u32.totalorder %s9044_s15, %s10347_s7 }
  0x48   :  { %p9050_p6 = pnand %p9048_p5, %p9045_p4 }
  0x4a   :  { %9053 = shalt.err (!%p9050_p6)
}
  0x4b   :  { %s9054_s3 = scalar_lea.vmem %s71_s11, 1024  ;;  %p9059_p8 = scmp.lt.s32.totalorder %s71_s11, %s71_s11 }
  0x4c   :  { %p9055_p7 = scmp.ne.s32.totalorder %s71_s11, %s9054_s3  ;;  %p9060_p9 = scmp.lt.s32.totalorder %s9054_s3, %s9054_s3 }
  0x4e   :  { %p9061_p10 = por %p9060_p9, %p9059_p8 }
  0x50   :  { %p9062_p11 = pnand %p9061_p10, %p9055_p7 }
  0x52   :  { %9065 = shalt.err (!%p9062_p11)
}
  0x53   :  { %76 = dma.hbm_to_vmem [thread:$0]  %s10347_s7, 1024, %s71_s11, [#allocation13], %s9098_s1, %s9098_s1, %s9099_s27  }
  0x54   :  { %9088 = dma.done.wait [#allocation7], 128  }
  0x55   :  { %9089 = vsyncadd [#allocation7], 4294967168 }
  0x56   :  { %9090 = dma.done.wait [#allocation10], 256  }
  0x57   :  { %9091 = vsyncadd [#allocation10], 4294967040 }
  0x58   :  { %9092 = dma.done.wait [#allocation13], 5120  }
  0x59   :  { %9093 = vsyncadd [#allocation13], 4294962176  ;;  %v9103_v0 = vmov 0.0|0.0   ;;  %vm9104_vm0 = vmmov 0   ;;  %v9105_v1 = vmov 0.0   ;;  %v100_v2 = vld [vmem:[#allocation12] sm:$0xff]  ;;  %v410_v50 = vlaneseq }
  0x5a   :  { %8798 = vmatprep.subr.bf16.mxu0 %v9103_v0  ;;  %8810 = vmatprep.subr.bf16.mxu1 %v9103_v0  ;;  %v101_v3 = vld [vmem:[#allocation12 + $0x8] sm:$0xff]  ;;  %v109_v4 = vld [vmem:[#allocation12 + $0x40] sm:$0xff]  ;;  %v102_v7 = vld [vmem:[#allocation12 + $0x10] sm:$0xff]  ;;  %vm149_vm1 = vcmask 523264   ;;  %vm455_vm2 = vcmask 130048   ;;  %s9107_s26 = smov 112  }
  0x5b   :  { %8262 = vmatprep.mubr.msk.f32.mxu0 %vm9104_vm0, %v9105_v1  ;;  %8281 = vmatprep.mubr.msk.f32.mxu1 %vm9104_vm0, %v9105_v1  ;;  %v9239_v5 = vpack.c.bf16 %v101_v3, %v100_v2  ;;  %v110_v6 = vld [vmem:[#allocation12 + $0x48] sm:$0xff]  ;;  %v103_v8 = vld [vmem:[#allocation12 + $0x18] sm:$0xff]  ;;  %v111_v10 = vld [vmem:[#allocation12 + $0x50] sm:$0xff]  ;;  %v9106_v48 = vmov 1966171168   ;;  %v411_v54 = vshrl.u32 %v410_v50, 7 }
  0x5c   :  { %v9241_v9 = vpack.c.bf16 %v110_v6, %v109_v4  ;;  %v112_v11 = vld [vmem:[#allocation12 + $0x58] sm:$0xff]  ;;  %v9244_v12 = vpack.c.bf16 %v103_v8, %v102_v7  ;;  %v104_v14 = vld [vmem:[#allocation12 + $0x20] sm:$0xff]  ;;  %v105_v15 = vld [vmem:[#allocation12 + $0x28] sm:$0xff]  ;;  %v408_v49 = vunpack.c.l.s4 %v9106_v48  ;;  %s9108_s28 = smov 96   ;;  %vm1065_vm3 = vcmask 1041409   ;;  %s9109_s29 = smov 80  }
  0x5d   :  { %8800 = vmatpush3.bf16.msra.mxu0 %v9239_v5  ;;  %v9248_v13 = vpack.c.bf16 %v112_v11, %v111_v10  ;;  %v113_v16 = vld [vmem:[#allocation12 + $0x60] sm:$0xff]  ;;  %v114_v17 = vld [vmem:[#allocation12 + $0x68] sm:$0xff]  ;;  %v9252_v18 = vpack.c.bf16 %v105_v15, %v104_v14  ;;  %v106_v20 = vld [vmem:[#allocation12 + $0x30] sm:$0xff]  ;;  %v9339_v7 = vsub.s32 0, %v411_v54  ;;  %vm1068_vm4 = vcmask 1042434   ;;  %s9110_s0 = smov 16  }
  0x5e   :  { %8812 = vmatpush3.bf16.msra.mxu1 %v9241_v9  ;;  %8801 = vmatprep.subr.bf16.mxu0 %v9103_v0  ;;  %v9256_v19 = vpack.c.bf16 %v114_v17, %v113_v16  ;;  %v107_v21 = vld [vmem:[#allocation12 + $0x38] sm:$0xff]  ;;  %v115_v22 = vld [vmem:[#allocation12 + $0x70] sm:$0xff]  ;;  %v118_v26 = vld [vmem:[#allocation12 + $0x80] sm:$0xff]  ;;  %v409_v53 = vunpack.c.0.s8 %v408_v49  ;;  %vm1071_vm5 = vcmask 1043459   ;;  %vm1074_vm6 = vcmask 1044484   ;;  %s9111_s9 = smov 32  }
  0x5f   :  { %8813 = vmatprep.subr.bf16.mxu1 %v9103_v0  ;;  %v116_v23 = vld [vmem:[#allocation12 + $0x78] sm:$0xff]  ;;  %v9260_v24 = vpack.c.bf16 %v107_v21, %v106_v20  ;;  %v119_v27 = vld [vmem:[#allocation12 + $0x88] sm:$0xff]  ;;  %v224_v30 = vld [vmem:[#allocation9] sm:$0xff]  ;;  %vm1077_vm7 = vcmask 1045509   ;;  %vm1080_vm8 = vcmask 1046534   ;;  %vm1083_vm9 = vcmask 1047559  }
  0x60   :  { %v9264_v25 = vpack.c.bf16 %v116_v23, %v115_v22  ;;  %v142_v28 = vld [vmem:[#allocation6] sm:$0xff]  ;;  %v9268_v29 = vpack.c.bf16 %v119_v27, %v118_v26  ;;  %v120_v31 = vld [vmem:[#allocation12 + $0x90] sm:$0xff]  ;;  %v121_v32 = vld [vmem:[#allocation12 + $0x98] sm:$0xff]  ;;  %v9315_v57 = vsub.s32 %v409_v53, %v411_v54  ;;  %vm1163_vm10 = vcmask 64512   ;;  %s9112_s10 = smov 64   ;;  %s9113_s11 = smov 48  }
  0x61   :  { %8803 = vmatpush3.bf16.msra.mxu0 %v9244_v12  ;;  %v9276_v33 = vpack.c.bf16 %v121_v32, %v120_v31  ;;  %v122_v34 = vld [vmem:[#allocation12 + $0xa0] sm:$0xff]  ;;  %v123_v35 = vld [vmem:[#allocation12 + $0xa8] sm:$0xff]  ;;  %v124_v37 = vld [vmem:[#allocation12 + $0xb0] sm:$0xff]  ;;  %vm2138_vm11 = vcmask 261248   ;;  %vm3029_vm12 = vcmask 392448   ;;  %vm3920_vm13 = vcmask 523648  }
  0x62   :  { %8815 = vmatpush3.bf16.msra.mxu1 %v9248_v13  ;;  %8804 = vmatprep.subr.bf16.mxu0 %v9103_v0  ;;  %v9284_v36 = vpack.c.bf16 %v123_v35, %v122_v34  ;;  %v125_v38 = vld [vmem:[#allocation12 + $0xb8] sm:$0xff]  ;;  %v9296_v41 = vld [vmem:[#allocation14] sm:$0xff]  ;;  %v7834_v42 = vld [vmem:[%s10344_s4] ss:$0 sm:$0xff]  ;;  %vm7812_vm14 = vcmask 1048064  }
  0x63   :  { %8816 = vmatprep.subr.bf16.mxu1 %v9103_v0  ;;  %v9288_v39 = vpack.c.bf16 %v125_v38, %v124_v37  ;;  %v305_v40 = vld [vmem:[#allocation11] sm:$0xff]  ;;  %v7836_v43 = vld [vmem:[%s10344_s4 + $0x1] ss:$0 sm:$0xff]  ;;  %v7840_v55 = vld [vmem:[%s10345_s5] ss:$0 sm:$0xff] }
  0x64   :  { %v7841_v56 = vld [vmem:[%s10346_s6] ss:$0 sm:$0xff]  ;;  %v7838_v10 = vld [vmem:[%s10344_s4 + $0x2] ss:$0 sm:$0xff]  ;;  %v9352_v14 = vld [vmem:[#allocation14 + $0x10] sm:$0xff] }
  0x65   :  { %8806 = vmatpush3.bf16.msra.mxu0 %v9252_v18  ;;  %v9330_v2 = vld [vmem:[#allocation14 + $0x8] sm:$0xff]  ;;  %v9368_v22 = vld [vmem:[#allocation14 + $0x18] sm:$0xff]  ;;  %v9383_v27 = vld [vmem:[#allocation14 + $0x20] sm:$0xff] }
  0x66   :  { %8818 = vmatpush3.bf16.msra.mxu1 %v9256_v19  ;;  %8807 = vmatprep.subr.bf16.mxu0 %v9103_v0  ;;  %v9397_v32 = vld [vmem:[#allocation14 + $0x28] sm:$0xff]  ;;  %v9411_v37 = vld [vmem:[#allocation14 + $0x30] sm:$0xff] }
  0x67   :  { %8819 = vmatprep.subr.bf16.mxu1 %v9103_v0 }
  0x69   :  { %8809 = vmatpush3.bf16.msra.mxu0 %v9260_v24 }
  0x6a   :  { %8821 = vmatpush3.bf16.msra.mxu1 %v9264_v25  ;;  %8822 = vmatprep.subr.bf16.mxu0 %v9103_v0 }
  0x6b   :  { %8303 = vmatprep.subr.mxu1 %v9105_v1 }
  0x6c   :  { %8263 = vmatmul.mubr.msk.f32.vlgmr.msra.gmra.mrb[0].mxu0 %vm149_vm1, %v142_v28 }
  0x6d   :  { %8282 = vmatmul.mubr.msk.f32.vlgmr.msra.gmra.mrb[0].mxu1 %vm149_vm1, %v224_v30  ;;  %8824 = vmatpush3.bf16.msra.mxu0 %v9268_v29 }
  0x6e   :  { %8825 = vmatprep.subr.bf16.mxu0 %v9103_v0  ;;  %8300 = vmatprep.mubr.msk.f32.mxu0 %vm9104_vm0, %v9105_v1 }
  0x6f   :  { %8305 = vmatprep.mubr.msk.f32.mxu1 %vm9104_vm0, %v9105_v1 }
  0x71   :  { %8827 = vmatpush3.bf16.msra.mxu0 %v9276_v33 }
  0x72   :  { %8828 = vmatprep.subr.bf16.mxu0 %v9103_v0 }
  0x73   :  { %8304 = vmatpush3.xpose.msk.msra.mxu1 %vm455_vm2, %v9296_v41 }
  0x74   :  { %8308 = vmatprep.subr.mxu1 %v9105_v1 }
  0x75   :  { %8830 = vmatpush3.bf16.msra.mxu0 %v9284_v36 }
  0x76   :  { %8831 = vmatprep.subr.bf16.mxu0 %v9103_v0 }
  0x79   :  { %8833 = vmatpush3.bf16.msra.mxu0 %v9288_v39 }
  0x7a   :  { %8343 = vmatprep.subr.mxu0 %v9105_v1 }
  0x7c   :  { %8301 = vmatmul.mubr.msk.f32.vlgmr.msra.gmra.mrb[2].mxu0 %vm149_vm1, %v305_v40 }
  0x7d   :  { %8345 = vmatprep.mubr.msk.f32.mxu0 %vm9104_vm0, %v9105_v1 }
 0x13f   :  { %v219_v44 = vpop.f32.mrb[0].mxu0 }
 0x140   :  { %v220_v45 = vadd.f32 %v7834_v42, %v219_v44  ;;  %v300_v46 = vpop.f32.mrb[0].mxu1  ;;  %v8264_v47 = vpop.f32.mrb[1].mxu0  ;;  %v9424_v42 = vld [vmem:[#allocation14 + $0x38] sm:$0xff] }
 0x141   :  { %v301_v51 = vadd.f32 %v7836_v43, %v300_v46  ;;  %v8283_v52 = vpop.f32.mrb[1].mxu1 }
 0x142   :  { %223 = vst.msk [vmem:[#allocation2] sm:$0xff] %vm149_vm1, %v220_v45 }
 0x143   :  { %304 = vst.msk [vmem:[#allocation3] sm:$0xff] %vm149_vm1, %v301_v51 }
 0x149   :  { %v386_v58 = vld [vmem:[#allocation2] sm:$0xff] }
 0x14a   :  { %v9317_v59 = vld [vmem:[#allocation3] sm:$0xff]  ;;  %v9319_v60 = vadd.f32 %v7840_v55, %v386_v58  ;;  %v404_v61 = vadd.f32 %v7841_v56, %v386_v58 }
 0x14b   :  { %8344 = vmatpush3.xpose.msk.msra.mxu0 %vm455_vm2, %v9317_v59 }
 0x14c   :  { %v413_v62 = vrot.slane %v404_v61, %v9315_v57  ;;  %8353 = vmatprep.subr.mxu0 %v9105_v1  ;;  %v1269_v16 = vcombine.high %v404_v61, %v404_v61 }
 0x14e   :  { %8346 = vmatmul.mubr.msk.f32.vlgmr.msra.gmra.mrb[4].mxu0 %vm455_vm2, %v9319_v60  ;;  %v9328_v63 = vrot.slane %v413_v62, %v9315_v57  ;;  %v1284_v3 = vcombine.high %v413_v62, %v413_v62  ;;  %v1283_v23 = vrot.slane %v1269_v16, %v9315_v57 }
 0x14f   :  { %v381_v4 = vpop.f32.mrb[2].mxu0  ;;  %8354 = vmatpush3.xpose.msk.msra.mxu0 %vm455_vm2, %v9296_v41  ;;  %8355 = vmatprep.mubr.msk.f32.mxu0 %vm9104_vm0, %v9105_v1 }
 0x150   :  { %8306 = vmatmul.mubr.msk.f32.vlgmr.msra.gmra.mrb[2].mxu1 %vm455_vm2, %v9328_v63  ;;  %v1306_v6 = vrot.slane %v1284_v3, %v9315_v57  ;;  %v8302_v8 = vpop.f32.mrb[3].mxu0  ;;  %v1314_v15 = vcombine.high %v9328_v63, %v9328_v63  ;;  %8363 = vmatprep.subr.mxu0 %v9105_v1  ;;  %v382_v17 = vadd.f32 %v7838_v10, %v381_v4 }
 0x151   :  { %8309 = vmatpush3.xpose.msk.msra.mxu1 %vm455_vm2, %v9330_v2  ;;  %8310 = vmatprep.mubr.msk.f32.mxu1 %vm9104_vm0, %v9105_v1  ;;  %v1299_v28 = vrot.slane %v1283_v23, %v9315_v57  ;;  %v1285_v30 = vcombine.high %v1283_v23, %v1283_v23  ;;  %v9452_v46 = vrot.slane %v9328_v63, %v9339_v7 }
 0x152   :  { %8313 = vmatprep.subr.mxu1 %v9105_v1  ;;  %v9350_v11 = vrot.slane %v1306_v6, %v9339_v7  ;;  %v1316_v20 = vcombine.high %v1306_v6, %v1306_v6  ;;  %v9366_v21 = vrot.slane %v1314_v15, %v9339_v7  ;;  %385 = vst.msk [vmem:[#allocation4] sm:$0xff] %vm149_vm1, %v382_v17 }
 0x153   :  { %v9395_v31 = vrot.slane %v1299_v28, %v9339_v7  ;;  %v1313_v34 = vrot.slane %v1285_v30, %v9315_v57  ;;  %v1315_v38 = vcombine.high %v1299_v28, %v1299_v28 }
 0x154   :  { %1400 = vrot.lane.b32.xlu1 %v9350_v11, %s9107_s26  ;;  %8311 = vmatmul.mubr.msk.f32.vlgmr.msra.gmra.mrb[4].mxu1 %vm455_vm2, %v1306_v6  ;;  %v9381_v26 = vrot.slane %v1316_v20, %v9339_v7 }
 0x155   :  { %8314 = vmatpush3.xpose.msk.msra.mxu1 %vm455_vm2, %v9352_v14  ;;  %8315 = vmatprep.mubr.msk.f32.mxu1 %vm9104_vm0, %v9105_v1  ;;  %v9409_v35 = vrot.slane %v1313_v34, %v9339_v7  ;;  %v9422_v40 = vrot.slane %v1315_v38, %v9339_v7  ;;  %v1317_v43 = vcombine.high %v1313_v34, %v1313_v34 }
 0x156   :  { %8318 = vmatprep.subr.mxu1 %v9105_v1 }
 0x157   :  { %v9434_v44 = vrot.slane %v1317_v43, %v9339_v7 }
 0x158   :  { %1478 = vrot.lane.b32.xlu1 %v9366_v21, %s9107_s26  ;;  %8316 = vmatmul.mubr.msk.f32.vlgmr.msra.gmra.mrb[6].mxu1 %vm455_vm2, %v1314_v15 }
 0x159   :  { %8319 = vmatpush3.xpose.msk.msra.mxu1 %vm455_vm2, %v9368_v22  ;;  %8320 = vmatprep.mubr.msk.f32.mxu1 %vm9104_vm0, %v9105_v1  ;;  %v9440_v45 = vld [vmem:[#allocation4] sm:$0xff] }
 0x15a   :  { %8323 = vmatprep.subr.mxu1 %v9105_v1 }
 0x15c   :  { %1556 = vrot.lane.b32.xlu1 %v9381_v26, %s9107_s26  ;;  %8321 = vmatmul.mubr.msk.f32.vlgmr.msra.gmra.mrb[8].mxu1 %vm455_vm2, %v1316_v20 }
 0x15d   :  { %8324 = vmatpush3.xpose.msk.msra.mxu1 %vm455_vm2, %v9383_v27  ;;  %8325 = vmatprep.mubr.msk.f32.mxu1 %vm9104_vm0, %v9105_v1 }
 0x15e   :  { %8328 = vmatprep.subr.mxu1 %v9105_v1 }
 0x160   :  { %1634 = vrot.lane.b32.xlu1 %v9395_v31, %s9107_s26  ;;  %8326 = vmatmul.mubr.msk.f32.vlgmr.msra.gmra.mrb[10].mxu1 %vm455_vm2, %v1299_v28 }
 0x161   :  { %8329 = vmatpush3.xpose.msk.msra.mxu1 %vm455_vm2, %v9397_v32  ;;  %8330 = vmatprep.mubr.msk.f32.mxu1 %vm9104_vm0, %v9105_v1 }
 0x162   :  { %8333 = vmatprep.subr.mxu1 %v9105_v1 }
 0x164   :  { %1712 = vrot.lane.b32.xlu1 %v9409_v35, %s9107_s26  ;;  %8331 = vmatmul.mubr.msk.f32.vlgmr.msra.gmra.mrb[12].mxu1 %vm455_vm2, %v1313_v34 }
 0x165   :  { %8334 = vmatpush3.xpose.msk.msra.mxu1 %vm455_vm2, %v9411_v37  ;;  %8335 = vmatprep.mubr.msk.f32.mxu1 %vm9104_vm0, %v9105_v1 }
 0x166   :  { %8338 = vmatprep.subr.mxu1 %v9105_v1 }
 0x168   :  { %1790 = vrot.lane.b32.xlu1 %v9422_v40, %s9107_s26  ;;  %8336 = vmatmul.mubr.msk.f32.vlgmr.msra.gmra.mrb[14].mxu1 %vm455_vm2, %v1315_v38 }
 0x169   :  { %8339 = vmatpush3.xpose.msk.msra.mxu1 %vm455_vm2, %v9424_v42  ;;  %8340 = vmatprep.mubr.msk.f32.mxu1 %vm9104_vm0, %v9105_v1 }
 0x16a   :  { %8348 = vmatprep.subr.mxu1 %v9105_v1 }
 0x16c   :  { %1868 = vrot.lane.b32.xlu1 %v9434_v44, %s9107_s26  ;;  %8341 = vmatmul.mubr.msk.f32.vlgmr.msra.gmra.mrb[16].mxu1 %vm455_vm2, %v1317_v43 }
 0x16d   :  { %8349 = vmatpush3.msra.mxu1 %v9440_v45  ;;  %8350 = vmatprep.mubr.msk.f32.mxu1 %vm9104_vm0, %v9105_v1 }
 0x16e   :  { %8358 = vmatprep.subr.mxu1 %v9105_v1 }
 0x170   :  { %1943 = vrot.lane.b32.xlu1 %v9319_v60, %s9107_s26 }
 0x174   :  { %2057 = vrot.lane.b32.xlu1 %v9440_v45, %s9107_s26 }
 0x178   :  { %2213 = vrot.lane.b32.xlu1 %v9452_v46, %s9108_s28 }
 0x17c   :  { %2291 = vrot.lane.b32.xlu1 %v9350_v11, %s9108_s28 }
 0x180   :  { %2369 = vrot.lane.b32.xlu1 %v9366_v21, %s9108_s28 }
 0x184   :  { %2447 = vrot.lane.b32.xlu1 %v9381_v26, %s9108_s28 }
 0x188   :  { %2525 = vrot.lane.b32.xlu1 %v9395_v31, %s9108_s28 }
 0x18c   :  { %2603 = vrot.lane.b32.xlu1 %v9409_v35, %s9108_s28 }
 0x190   :  { %2681 = vrot.lane.b32.xlu1 %v9422_v40, %s9108_s28 }
 0x194   :  { %2837 = vrot.lane.b32.xlu1 %v9317_v59, %s9108_s28 }
 0x198   :  { %2834 = vrot.lane.b32.xlu1 %v9319_v60, %s9108_s28 }
 0x221   :  { %v1158_v47 = vpop.f32.mrb[4].mxu0 }
 0x222   :  { %v8347_v48 = vpop.f32.mrb[5].mxu0 }
 0x223   :  { %v527_v49 = vpop.f32.mrb[2].mxu1 }
 0x224   :  { %v8307_v50 = vpop.f32.mrb[3].mxu1 }
 0x227   :  { %v602_v51 = vpop.f32.mrb[4].mxu1 }
 0x228   :  { %v1064_v52 = vrot.slane %v602_v51, 7  ;;  %v8312_v53 = vpop.f32.mrb[5].mxu1 }
 0x22a   :  { %v1066_v54 = vsel %vm1065_vm3, %v1064_v52, %v527_v49 }
 0x22b   :  { %v677_v55 = vpop.f32.mrb[6].mxu1 }
 0x22c   :  { %v1067_v56 = vrot.slane %v677_v55, 6  ;;  %v8317_v58 = vpop.f32.mrb[7].mxu1 }
 0x22e   :  { %v1069_v61 = vsel %vm1068_vm4, %v1067_v56, %v1066_v54  ;;  %v1401_v54 = vpop.permute.xlu1 %1400 }
 0x22f   :  { %v752_v62 = vpop.f32.mrb[8].mxu1 }
 0x230   :  { %v1070_v63 = vrot.slane %v752_v62, 5  ;;  %v8322_v3 = vpop.f32.mrb[9].mxu1 }
 0x232   :  { %v1072_v4 = vsel %vm1071_vm5, %v1070_v63, %v1069_v61  ;;  %v1479_v55 = vpop.permute.xlu1 %1478 }
 0x233   :  { %v827_v6 = vpop.f32.mrb[10].mxu1 }
 0x234   :  { %v1073_v8 = vrot.slane %v827_v6, 4  ;;  %v8327_v10 = vpop.f32.mrb[11].mxu1 }
 0x236   :  { %v1075_v15 = vsel %vm1074_vm6, %v1073_v8, %v1072_v4  ;;  %v1557_v56 = vpop.permute.xlu1 %1556 }
 0x237   :  { %v902_v16 = vpop.f32.mrb[12].mxu1 }
 0x238   :  { %v1076_v17 = vrot.slane %v902_v16, 3  ;;  %v8332_v20 = vpop.f32.mrb[13].mxu1 }
 0x23a   :  { %v1078_v23 = vsel %vm1077_vm7, %v1076_v17, %v1075_v15  ;;  %v1635_v58 = vpop.permute.xlu1 %1634 }
 0x23b   :  { %v977_v28 = vpop.f32.mrb[14].mxu1 }
 0x23c   :  { %v1079_v30 = vrot.slane %v977_v28, 2  ;;  %v8337_v34 = vpop.f32.mrb[15].mxu1 }
 0x23e   :  { %v1081_v38 = vsel %vm1080_vm8, %v1079_v30, %v1078_v23  ;;  %v1713_v61 = vpop.permute.xlu1 %1712 }
 0x23f   :  { %v1052_v43 = vpop.f32.mrb[16].mxu1 }
 0x240   :  { %v1082_v48 = vrot.slane %v1052_v43, 1  ;;  %v8342_v49 = vpop.f32.mrb[17].mxu1 }
 0x242   :  { %v1084_v50 = vsel %vm1083_vm9, %v1082_v48, %v1081_v38  ;;  %v1791_v62 = vpop.permute.xlu1 %1790 }
 0x243   :  { %v1159_v51 = vadd.f32 %v1158_v47, %v1084_v50 }
 0x245   :  { %v1162_v52 = vmul.f32 0.25, %v1159_v51 }
 0x246   :  { %v1869_v63 = vpop.permute.xlu1 %1868 }
 0x247   :  { %v1164_v53 = vsel %vm1163_vm10, %v1162_v52, -inf }
 0x248   :  { %1165 = vmax.xlane.f32.xlu0 %v1164_v53 }
 0x24a   :  { %v1944_v3 = vpop.permute.xlu1 %1943 }
 0x24e   :  { %v2058_v47 = vpop.permute.xlu1 %2057 }
 0x252   :  { %v2214_v4 = vpop.permute.xlu1 %2213 }
 0x256   :  { %v9484_v6 = vpop.permute.xlu1 %2291 }
 0x25a   :  { %v2370_v16 = vpop.permute.xlu1 %2369 }
 0x25e   :  { %1322 = vrot.lane.b32.xlu0 %v9452_v46, %s9107_s26  ;;  %v9493_v20 = vpop.permute.xlu1 %2447 }
 0x262   :  { %1946 = vrot.lane.b32.xlu0 %v9317_v59, %s9107_s26  ;;  %v2526_v28 = vpop.permute.xlu1 %2525 }
 0x266   :  { %v9524_v34 = vpop.permute.xlu1 %2603 }
 0x26a   :  { %v2682_v38 = vpop.permute.xlu1 %2681 }
 0x26e   :  { %v2838_v43 = vpop.permute.xlu1 %2837 }
 0x272   :  { %v2835_v48 = vpop.permute.xlu1 %2834 }
 0x2d5   :  { %v1166_v8 = vpop.xlane.xlu0 %1165 }
 0x2d6   :  { %v1167_v10 = vsub.f32 %v1162_v52, %v1166_v8 }
 0x2d8   :  { %v1168_v15 = vmul.f32 1.442695, %v1167_v10 }
 0x2d9   :  { %v1323_v17 = vpop.permute.xlu0 %1322 }
 0x2da   :  { %8913 = vpow2.f32 %v1168_v15  ;;  %8356 = vmatmul.mubr.msk.f32.vlgmr.msra.gmra.mrb[6].mxu0 %vm455_vm2, %v1323_v17 }
 0x2db   :  { %8364 = vmatpush3.xpose.msk.msra.mxu0 %vm455_vm2, %v9352_v14  ;;  %8365 = vmatprep.mubr.msk.f32.mxu0 %vm9104_vm0, %v9105_v1 }
 0x2dc   :  { %8373 = vmatprep.subr.mxu0 %v9105_v1 }
 0x2dd   :  { %v1947_v30 = vpop.permute.xlu0 %1946 }
 0x2de   :  { %8366 = vmatmul.mubr.msk.f32.vlgmr.msra.gmra.mrb[8].mxu0 %vm455_vm2, %v1479_v55 }
 0x2df   :  { %8374 = vmatpush3.xpose.msk.msra.mxu0 %vm455_vm2, %v9383_v27  ;;  %8375 = vmatprep.mubr.msk.f32.mxu0 %vm9104_vm0, %v9105_v1 }
 0x2e0   :  { %8383 = vmatprep.subr.mxu0 %v9105_v1 }
 0x2e2   :  { %8376 = vmatmul.mubr.msk.f32.vlgmr.msra.gmra.mrb[10].mxu0 %vm455_vm2, %v1635_v58 }
 0x2e3   :  { %8384 = vmatpush3.xpose.msk.msra.mxu0 %vm455_vm2, %v9411_v37  ;;  %8385 = vmatprep.mubr.msk.f32.mxu0 %vm9104_vm0, %v9105_v1 }
 0x2e4   :  { %v9505_v23 = vpop.eup %8913  ;;  %8393 = vmatprep.subr.mxu0 %v9105_v1 }
 0x2e5   :  { %8351 = vmatmul.mubr.msk.f32.vlgmr.msra.gmra.mrb[18].mxu1 %vm1163_vm10, %v9505_v23 }
 0x2e6   :  { %8359 = vmatpush3.xpose.msk.msra.mxu1 %vm455_vm2, %v9330_v2  ;;  %8386 = vmatmul.mubr.msk.f32.vlgmr.msra.gmra.mrb[12].mxu0 %vm455_vm2, %v1791_v62 }
 0x2e7   :  { %8394 = vmatpush3.xpose.msk.msra.mxu0 %vm455_vm2, %v1947_v30  ;;  %8360 = vmatprep.mubr.msk.f32.mxu1 %vm9104_vm0, %v9105_v1 }
 0x2e8   :  { %8368 = vmatprep.subr.mxu1 %v9105_v1  ;;  %8395 = vmatprep.mubr.msk.f32.mxu0 %vm9104_vm0, %v9105_v1 }
 0x2e9   :  { %8361 = vmatmul.mubr.msk.f32.vlgmr.msra.gmra.mrb[20].mxu1 %vm455_vm2, %v1401_v54  ;;  %8403 = vmatprep.subr.mxu0 %v9105_v1 }
 0x2ea   :  { %8369 = vmatpush3.xpose.msk.msra.mxu1 %vm455_vm2, %v9368_v22  ;;  %8396 = vmatmul.mubr.msk.f32.vlgmr.msra.gmra.mrb[14].mxu0 %vm455_vm2, %v1944_v3 }
 0x2eb   :  { %8404 = vmatpush3.xpose.msk.msra.mxu0 %vm455_vm2, %v9296_v41  ;;  %8370 = vmatprep.mubr.msk.f32.mxu1 %vm9104_vm0, %v9105_v1 }
 0x2ec   :  { %8378 = vmatprep.subr.mxu1 %v9105_v1  ;;  %8405 = vmatprep.mubr.msk.f32.mxu0 %vm9104_vm0, %v9105_v1 }
 0x2ed   :  { %8371 = vmatmul.mubr.msk.f32.vlgmr.msra.gmra.mrb[22].mxu1 %vm455_vm2, %v1557_v56  ;;  %8413 = vmatprep.subr.mxu0 %v9105_v1 }
 0x2ee   :  { %8379 = vmatpush3.xpose.msk.msra.mxu1 %vm455_vm2, %v9397_v32  ;;  %8406 = vmatmul.mubr.msk.f32.vlgmr.msra.gmra.mrb[16].mxu0 %vm455_vm2, %v2214_v4 }
 0x2ef   :  { %8414 = vmatpush3.xpose.msk.msra.mxu0 %vm455_vm2, %v9352_v14  ;;  %8380 = vmatprep.mubr.msk.f32.mxu1 %vm9104_vm0, %v9105_v1 }
 0x2f0   :  { %8388 = vmatprep.subr.mxu1 %v9105_v1  ;;  %8415 = vmatprep.mubr.msk.f32.mxu0 %vm9104_vm0, %v9105_v1 }
 0x2f1   :  { %8381 = vmatmul.mubr.msk.f32.vlgmr.msra.gmra.mrb[24].mxu1 %vm455_vm2, %v1713_v61  ;;  %8423 = vmatprep.subr.mxu0 %v9105_v1 }
 0x2f2   :  { %8389 = vmatpush3.xpose.msk.msra.mxu1 %vm455_vm2, %v9424_v42  ;;  %8416 = vmatmul.mubr.msk.f32.vlgmr.msra.gmra.mrb[18].mxu0 %vm455_vm2, %v2370_v16 }
 0x2f3   :  { %8424 = vmatpush3.xpose.msk.msra.mxu0 %vm455_vm2, %v9383_v27  ;;  %8390 = vmatprep.mubr.msk.f32.mxu1 %vm9104_vm0, %v9105_v1 }
 0x2f4   :  { %8398 = vmatprep.subr.mxu1 %v9105_v1  ;;  %8425 = vmatprep.mubr.msk.f32.mxu0 %vm9104_vm0, %v9105_v1 }
 0x2f5   :  { %8391 = vmatmul.mubr.msk.f32.vlgmr.msra.gmra.mrb[26].mxu1 %vm455_vm2, %v1869_v63  ;;  %8433 = vmatprep.subr.mxu0 %v9105_v1 }
 0x2f6   :  { %8399 = vmatpush3.msra.mxu1 %v2058_v47  ;;  %8426 = vmatmul.mubr.msk.f32.vlgmr.msra.gmra.mrb[20].mxu0 %vm455_vm2, %v2526_v28 }
 0x2f7   :  { %8434 = vmatpush3.xpose.msk.msra.mxu0 %vm455_vm2, %v9411_v37  ;;  %8435 = vmatprep.mubr.msk.f32.mxu0 %vm9104_vm0, %v9105_v1 }
 0x2f8   :  { %8443 = vmatprep.subr.mxu0 %v9105_v1  ;;  %8400 = vmatprep.mubr.msk.f32.mxu1 %vm9104_vm0, %v9105_v1 }
 0x2f9   :  { %8408 = vmatprep.subr.mxu1 %v9105_v1 }
 0x2fa   :  { %8436 = vmatmul.mubr.msk.f32.vlgmr.msra.gmra.mrb[22].mxu0 %vm455_vm2, %v2682_v38 }
 0x2fb   :  { %8444 = vmatpush3.xpose.msk.msra.mxu0 %vm455_vm2, %v2838_v43  ;;  %8445 = vmatprep.mubr.msk.f32.mxu0 %vm9104_vm0, %v9105_v1 }
 0x2fc   :  { %8453 = vmatprep.subr.mxu0 %v9105_v1 }
 0x2fe   :  { %8446 = vmatmul.mubr.msk.f32.vlgmr.msra.gmra.mrb[24].mxu0 %vm455_vm2, %v2835_v48 }
 0x2ff   :  { %8454 = vmatpush3.xpose.msk.msra.mxu0 %vm455_vm2, %v9296_v41  ;;  %8455 = vmatprep.mubr.msk.f32.mxu0 %vm9104_vm0, %v9105_v1 }
 0x300   :  { %8463 = vmatprep.subr.mxu0 %v9105_v1 }
 0x3ad   :  { %v1392_v49 = vpop.f32.mrb[6].mxu0 }
 0x3ae   :  { %v8357_v50 = vpop.f32.mrb[7].mxu0 }
 0x3b1   :  { %v1548_v51 = vpop.f32.mrb[8].mxu0 }
 0x3b2   :  { %v8367_v52 = vpop.f32.mrb[9].mxu0  ;;  %v1958_v47 = vrot.slane %v1548_v51, 6 }
 0x3b5   :  { %v1704_v53 = vpop.f32.mrb[10].mxu0 }
 0x3b6   :  { %v8377_v54 = vpop.f32.mrb[11].mxu0  ;;  %v1962_v30 = vrot.slane %v1704_v53, 4 }
 0x3b8   :  { %v9579_v55 = vpop.f32.mrb[18].mxu1 }
 0x3b9   :  { %v8352_v56 = vpop.f32.mrb[19].mxu1  ;;  %v1860_v58 = vpop.f32.mrb[12].mxu0 }
 0x3ba   :  { %v8387_v61 = vpop.f32.mrb[13].mxu0  ;;  %v1966_v56 = vrot.slane %v1860_v58, 2 }
 0x3bc   :  { %v1470_v62 = vpop.f32.mrb[20].mxu1 }
 0x3bd   :  { %v1956_v63 = vrot.slane %v1470_v62, 7  ;;  %v8362_v3 = vpop.f32.mrb[21].mxu1  ;;  %v2041_v41 = vpop.f32.mrb[14].mxu0 }
 0x3be   :  { %v8397_v4 = vpop.f32.mrb[15].mxu0 }
 0x3bf   :  { %v1957_v8 = vsel %vm1065_vm3, %v1956_v63, %v1392_v49 }
 0x3c0   :  { %v1626_v10 = vpop.f32.mrb[22].mxu1  ;;  %v1959_v15 = vsel %vm1068_vm4, %v1958_v47, %v1957_v8 }
 0x3c1   :  { %v1960_v16 = vrot.slane %v1626_v10, 5  ;;  %v8372_v17 = vpop.f32.mrb[23].mxu1  ;;  %v9583_v28 = vpop.f32.mrb[16].mxu0 }
 0x3c2   :  { %v8407_v38 = vpop.f32.mrb[17].mxu0 }
 0x3c3   :  { %v1961_v43 = vsel %vm1071_vm5, %v1960_v16, %v1959_v15 }
 0x3c4   :  { %v1782_v48 = vpop.f32.mrb[24].mxu1  ;;  %v1963_v50 = vsel %vm1074_vm6, %v1962_v30, %v1961_v43 }
 0x3c5   :  { %v1964_v52 = vrot.slane %v1782_v48, 3  ;;  %v8382_v54 = vpop.f32.mrb[25].mxu1  ;;  %v9587_v51 = vpop.f32.mrb[18].mxu0 }
 0x3c6   :  { %v8417_v49 = vpop.f32.mrb[19].mxu0 }
 0x3c7   :  { %v1965_v61 = vsel %vm1077_vm7, %v1964_v52, %v1963_v50  ;;  %v2849_v52 = vrot.slane %v9587_v51, 6 }
 0x3c8   :  { %v1938_v62 = vpop.f32.mrb[26].mxu1  ;;  %v1967_v63 = vsel %vm1080_vm8, %v1966_v56, %v1965_v61 }
 0x3c9   :  { %v1968_v3 = vrot.slane %v1938_v62, 1  ;;  %v8392_v47 = vpop.f32.mrb[27].mxu1  ;;  %v9591_v53 = vpop.f32.mrb[20].mxu0 }
 0x3ca   :  { %v8427_v4 = vpop.f32.mrb[21].mxu0 }
 0x3cb   :  { %v1969_v8 = vsel %vm1083_vm9, %v1968_v3, %v1967_v63  ;;  %v2853_v3 = vrot.slane %v9591_v53, 4 }
 0x3cc   :  { %v2042_v10 = vadd.f32 %v2041_v41, %v1969_v8 }
 0x3cd   :  { %v9594_v15 = vpop.f32.mrb[22].mxu0 }
 0x3ce   :  { %v8437_v16 = vpop.f32.mrb[23].mxu0  ;;  %v2045_v17 = vmul.f32 0.25, %v2042_v10  ;;  %v2857_v51 = vrot.slane %v9594_v15, 2 }
 0x3d0   :  { %v2046_v58 = vsel %vm1163_vm10, %v2045_v17, -inf }
 0x3d1   :  { %v9597_v30 = vpop.f32.mrb[24].mxu0  ;;  %2047 = vmax.xlane.f32.xlu0 %v2046_v58 }
 0x3d2   :  { %v8447_v38 = vpop.f32.mrb[25].mxu0 }
 0x3e7   :  { %2759 = vrot.lane.b32.xlu0 %v9434_v44, %s9108_s28 }
 0x3eb   :  { %2948 = vrot.lane.b32.xlu0 %v9440_v45, %s9108_s28 }
 0x3ef   :  { %3104 = vrot.lane.b32.xlu0 %v9452_v46, %s9109_s29 }
 0x3f3   :  { %3182 = vrot.lane.b32.xlu0 %v9350_v11, %s9109_s29 }
 0x3f7   :  { %3260 = vrot.lane.b32.xlu0 %v9366_v21, %s9109_s29 }
 0x3fb   :  { %3338 = vrot.lane.b32.xlu0 %v9381_v26, %s9109_s29 }
 0x3ff   :  { %3416 = vrot.lane.b32.xlu0 %v9395_v31, %s9109_s29 }
 0x403   :  { %3494 = vrot.lane.b32.xlu0 %v9409_v35, %s9109_s29 }
 0x407   :  { %3650 = vrot.lane.b32.xlu0 %v9434_v44, %s9109_s29 }
 0x40b   :  { %3728 = vrot.lane.b32.xlu0 %v9317_v59, %s9109_s29 }
 0x40f   :  { %3725 = vrot.lane.b32.xlu0 %v9319_v60, %s9109_s29 }
 0x45e   :  { %v2048_v11 = vpop.xlane.xlu0 %2047 }
 0x45f   :  { %v2049_v21 = vsub.f32 %v2045_v17, %v2048_v11 }
 0x461   :  { %v2050_v46 = vmul.f32 1.442695, %v2049_v21 }
 0x462   :  { %v2760_v41 = vpop.permute.xlu0 %2759 }
 0x463   :  { %8915 = vpow2.f32 %v2050_v46 }
 0x466   :  { %v2949_v26 = vpop.permute.xlu0 %2948 }
 0x46a   :  { %v3105_v43 = vpop.permute.xlu0 %3104 }
 0x46b   :  { %8456 = vmatmul.mubr.msk.f32.vlgmr.msra.gmra.mrb[26].mxu0 %vm455_vm2, %v3105_v43 }
 0x46c   :  { %8464 = vmatpush3.xpose.msk.msra.mxu0 %vm455_vm2, %v9352_v14  ;;  %8465 = vmatprep.mubr.msk.f32.mxu0 %vm9104_vm0, %v9105_v1 }
 0x46d   :  { %v9626_v31 = vpop.eup %8915  ;;  %8473 = vmatprep.subr.mxu0 %v9105_v1 }
 0x46e   :  { %8401 = vmatmul.mubr.msk.f32.vlgmr.msra.gmra.mrb[28].mxu1 %vm1163_vm10, %v9626_v31  ;;  %v9631_v59 = vpop.permute.xlu0 %3182  ;;  %v2052_v15 = vsel %vm1163_vm10, %v9626_v31, 0.0 }
 0x46f   :  { %8409 = vmatpush3.xpose.msk.msra.mxu1 %vm455_vm2, %v9330_v2  ;;  %8410 = vmatprep.mubr.msk.f32.mxu1 %vm9104_vm0, %v9105_v1 }
 0x470   :  { %8418 = vmatprep.subr.mxu1 %v9105_v1 }
 0x472   :  { %8411 = vmatmul.mubr.msk.f32.vlgmr.msra.gmra.mrb[30].mxu1 %vm455_vm2, %v9484_v6  ;;  %v3261_v60 = vpop.permute.xlu0 %3260 }
 0x473   :  { %8419 = vmatpush3.xpose.msk.msra.mxu1 %vm455_vm2, %v9368_v22  ;;  %8466 = vmatmul.mubr.msk.f32.vlgmr.msra.gmra.mrb[28].mxu0 %vm455_vm2, %v3261_v60 }
 0x474   :  { %8420 = vmatprep.mubr.msk.f32.mxu1 %vm9104_vm0, %v9105_v1  ;;  %8428 = vmatprep.subr.mxu1 %v9105_v1 }
 0x475   :  { %8474 = vmatpush3.xpose.msk.msra.mxu0 %vm455_vm2, %v9383_v27  ;;  %8475 = vmatprep.mubr.msk.f32.mxu0 %vm9104_vm0, %v9105_v1 }
 0x476   :  { %8421 = vmatmul.mubr.msk.f32.vlgmr.msra.gmra.mrb[32].mxu1 %vm455_vm2, %v9493_v20  ;;  %v9652_v14 = vpop.permute.xlu0 %3338  ;;  %8483 = vmatprep.subr.mxu0 %v9105_v1 }
 0x477   :  { %8429 = vmatpush3.xpose.msk.msra.mxu1 %vm455_vm2, %v9397_v32  ;;  %8430 = vmatprep.mubr.msk.f32.mxu1 %vm9104_vm0, %v9105_v1 }
 0x478   :  { %8438 = vmatprep.subr.mxu1 %v9105_v1 }
 0x47a   :  { %8431 = vmatmul.mubr.msk.f32.vlgmr.msra.gmra.mrb[34].mxu1 %vm455_vm2, %v9524_v34  ;;  %v3417_v27 = vpop.permute.xlu0 %3416 }
 0x47b   :  { %8439 = vmatpush3.xpose.msk.msra.mxu1 %vm455_vm2, %v9424_v42  ;;  %8476 = vmatmul.mubr.msk.f32.vlgmr.msra.gmra.mrb[30].mxu0 %vm455_vm2, %v3417_v27 }
 0x47c   :  { %8440 = vmatprep.mubr.msk.f32.mxu1 %vm9104_vm0, %v9105_v1  ;;  %8448 = vmatprep.subr.mxu1 %v9105_v1 }
 0x47d   :  { %8484 = vmatpush3.xpose.msk.msra.mxu0 %vm455_vm2, %v9411_v37  ;;  %8485 = vmatprep.mubr.msk.f32.mxu0 %vm9104_vm0, %v9105_v1 }
 0x47e   :  { %8441 = vmatmul.mubr.msk.f32.vlgmr.msra.gmra.mrb[36].mxu1 %vm455_vm2, %v2760_v41  ;;  %8493 = vmatprep.subr.mxu0 %v9105_v1  ;;  %v3495_v60 = vpop.permute.xlu0 %3494 }
 0x47f   :  { %8449 = vmatpush3.msra.mxu1 %v2949_v26  ;;  %8450 = vmatprep.mubr.msk.f32.mxu1 %vm9104_vm0, %v9105_v1 }
 0x480   :  { %8458 = vmatprep.subr.mxu1 %v9105_v1 }
 0x482   :  { %v3651_v27 = vpop.permute.xlu0 %3650 }
 0x53e   :  { %v9677_v35 = vpop.f32.mrb[26].mxu0 }
 0x53f   :  { %v8457_v44 = vpop.f32.mrb[27].mxu0 }
 0x541   :  { %v9679_v6 = vpop.f32.mrb[28].mxu1 }
 0x542   :  { %v8402_v20 = vpop.f32.mrb[29].mxu1 }
 0x545   :  { %v2361_v37 = vpop.f32.mrb[30].mxu1 }
 0x546   :  { %v2847_v34 = vrot.slane %v2361_v37, 7  ;;  %v8412_v48 = vpop.f32.mrb[31].mxu1  ;;  %v9681_v50 = vpop.f32.mrb[28].mxu0 }
 0x547   :  { %v8467_v54 = vpop.f32.mrb[29].mxu0  ;;  %v3729_v37 = vpop.permute.xlu0 %3728 }
 0x548   :  { %v2848_v56 = vsel %vm1065_vm3, %v2847_v34, %v9583_v28 }
 0x549   :  { %v2517_v49 = vpop.f32.mrb[32].mxu1  ;;  %v2850_v61 = vsel %vm1068_vm4, %v2849_v52, %v2848_v56 }
 0x54a   :  { %v2851_v62 = vrot.slane %v2517_v49, 5  ;;  %v8422_v63 = vpop.f32.mrb[33].mxu1 }
 0x54c   :  { %v2852_v47 = vsel %vm1071_vm5, %v2851_v62, %v2850_v61  ;;  %v3740_v62 = vrot.slane %v9681_v50, 6 }
 0x54d   :  { %v2673_v4 = vpop.f32.mrb[34].mxu1  ;;  %v2854_v8 = vsel %vm1074_vm6, %v2853_v3, %v2852_v47 }
 0x54e   :  { %v2855_v10 = vrot.slane %v2673_v4, 3  ;;  %v8432_v16 = vpop.f32.mrb[35].mxu1  ;;  %v9690_v17 = vpop.f32.mrb[30].mxu0 }
 0x54f   :  { %v8477_v58 = vpop.f32.mrb[31].mxu0 }
 0x550   :  { %v2856_v28 = vsel %vm1077_vm7, %v2855_v10, %v2854_v8  ;;  %v3744_v8 = vrot.slane %v9690_v17, 4 }
 0x551   :  { %v2829_v38 = vpop.f32.mrb[36].mxu1  ;;  %v2858_v11 = vsel %vm1080_vm8, %v2857_v51, %v2856_v28 }
 0x552   :  { %v2859_v21 = vrot.slane %v2829_v38, 1  ;;  %v8442_v46 = vpop.f32.mrb[37].mxu1 }
 0x554   :  { %v2860_v53 = vsel %vm1083_vm9, %v2859_v21, %v2858_v11 }
 0x555   :  { %v2933_v41 = vadd.f32 %v9597_v30, %v2860_v53 }
 0x557   :  { %v2936_v26 = vmul.f32 0.25, %v2933_v41 }
 0x559   :  { %v2937_v43 = vsel %vm1163_vm10, %v2936_v26, -inf }
 0x55a   :  { %2938 = vmax.xlane.f32.xlu1 %v2937_v43 }
 0x56b   :  { %3572 = vrot.lane.b32.xlu1 %v9422_v40, %s9109_s29  ;;  %v3726_v40 = vpop.permute.xlu0 %3725 }
 0x56f   :  { %3839 = vrot.lane.b32.xlu1 %v9440_v45, %s9109_s29 }
 0x593   :  { %2053 = vadd.xlane.f32.xlu1 %v2052_v15 }
 0x5e7   :  { %v2939_v44 = vpop.xlane.xlu1 %2938 }
 0x5e8   :  { %v2940_v20 = vsub.f32 %v2936_v26, %v2939_v44 }
 0x5ea   :  { %v2941_v30 = vmul.f32 1.442695, %v2940_v20 }
 0x5eb   :  { %v3573_v34 = vpop.permute.xlu1 %3572 }
 0x5ec   :  { %8917 = vpow2.f32 %v2941_v30  ;;  %8486 = vmatmul.mubr.msk.f32.vlgmr.msra.gmra.mrb[32].mxu0 %vm455_vm2, %v3573_v34 }
 0x5ed   :  { %8494 = vmatpush3.xpose.msk.msra.mxu0 %vm455_vm2, %v3729_v37  ;;  %8495 = vmatprep.mubr.msk.f32.mxu0 %vm9104_vm0, %v9105_v1  ;;  %v1170_v37 = vsel %vm1163_vm10, %v9505_v23, 0.0  ;;  %v4080_v23 = vld [vmem:[#allocation9] sm:$0xff] }
 0x5ee   :  { %8834 = vmatprep.subr.bf16.mxu0 %v9103_v0 }
 0x5f0   :  { %8496 = vmatmul.mubr.msk.f32.vlgmr.msra.gmra.mrb[34].mxu0 %vm455_vm2, %v3726_v40  ;;  %v127_v40 = vld [vmem:[#allocation12 + $0xc0] sm:$0xff] }
 0x5f1   :  { %8519 = vmatprep.mubr.msk.f32.mxu0 %vm9104_vm0, %v9105_v1 }
 0x5f6   :  { %v8918_v45 = vpop.eup %8917 }
 0x5f7   :  { %8451 = vmatmul.mubr.msk.f32.vlgmr.msra.gmra.mrb[38].mxu1 %vm1163_vm10, %v8918_v45  ;;  %v2943_v43 = vsel %vm1163_vm10, %v8918_v45, 0.0 }
 0x5f8   :  { %8459 = vmatpush3.xpose.msk.msra.mxu1 %vm455_vm2, %v9330_v2  ;;  %8460 = vmatprep.mubr.msk.f32.mxu1 %vm9104_vm0, %v9105_v1  ;;  %v3840_v2 = vpop.permute.xlu1 %3839 }
 0x5f9   :  { %8468 = vmatprep.subr.mxu1 %v9105_v1 }
 0x5fb   :  { %8461 = vmatmul.mubr.msk.f32.vlgmr.msra.gmra.mrb[40].mxu1 %vm455_vm2, %v9631_v59 }
 0x5fc   :  { %8469 = vmatpush3.xpose.msk.msra.mxu1 %vm455_vm2, %v9368_v22  ;;  %8470 = vmatprep.mubr.msk.f32.mxu1 %vm9104_vm0, %v9105_v1 }
 0x5fd   :  { %8478 = vmatprep.subr.mxu1 %v9105_v1 }
 0x5ff   :  { %8471 = vmatmul.mubr.msk.f32.vlgmr.msra.gmra.mrb[42].mxu1 %vm455_vm2, %v9652_v14 }
 0x600   :  { %8479 = vmatpush3.xpose.msk.msra.mxu1 %vm455_vm2, %v9397_v32  ;;  %8480 = vmatprep.mubr.msk.f32.mxu1 %vm9104_vm0, %v9105_v1 }
 0x601   :  { %8488 = vmatprep.subr.mxu1 %v9105_v1 }
 0x603   :  { %8481 = vmatmul.mubr.msk.f32.vlgmr.msra.gmra.mrb[44].mxu1 %vm455_vm2, %v3495_v60 }
 0x604   :  { %8489 = vmatpush3.xpose.msk.msra.mxu1 %vm455_vm2, %v9424_v42  ;;  %8490 = vmatprep.mubr.msk.f32.mxu1 %vm9104_vm0, %v9105_v1 }
 0x605   :  { %8498 = vmatprep.subr.mxu1 %v9105_v1 }
 0x607   :  { %8491 = vmatmul.mubr.msk.f32.vlgmr.msra.gmra.mrb[46].mxu1 %vm455_vm2, %v3651_v27 }
 0x608   :  { %8499 = vmatpush3.msra.mxu1 %v3840_v2  ;;  %8500 = vmatprep.mubr.msk.f32.mxu1 %vm9104_vm0, %v9105_v1  ;;  %v130_v2 = vld [vmem:[#allocation12 + $0xd8] sm:$0xff] }
 0x609   :  { %8846 = vmatprep.subr.bf16.mxu1 %v9103_v0 }
 0x620   :  { %v2054_v22 = vpop.xlane.xlu1 %2053 }
 0x621   :  { %8919 = vrcp.f32 %v2054_v22 }
 0x62b   :  { %v8920_v32 = vpop.eup %8919 }
 0x62c   :  { %v2133_v31 = vmul.f32 %v8920_v32, %v9679_v6 }
 0x62e   :  { %2135 = vrot.lane.b32.xlu1 %v2133_v31, %s9110_s0 }
 0x6bf   :  { %v3642_v42 = vpop.f32.mrb[32].mxu0 }
 0x6c0   :  { %v8487_v59 = vpop.f32.mrb[33].mxu0  ;;  %v3748_v38 = vrot.slane %v3642_v42, 2 }
 0x6c1   :  { %v2136_v59 = vpop.permute.xlu1 %2135 }
 0x6c3   :  { %v3823_v14 = vpop.f32.mrb[34].mxu0 }
 0x6c4   :  { %v8497_v48 = vpop.f32.mrb[35].mxu0 }
 0x6c5   :  { %v131_v48 = vld [vmem:[#allocation12 + $0xe0] sm:$0xff] }
 0x6ca   :  { %v3020_v52 = vpop.f32.mrb[38].mxu1 }
 0x6cb   :  { %v8452_v54 = vpop.f32.mrb[39].mxu1 }
 0x6ce   :  { %v3252_v56 = vpop.f32.mrb[40].mxu1 }
 0x6cf   :  { %v3738_v49 = vrot.slane %v3252_v56, 7  ;;  %v8462_v61 = vpop.f32.mrb[41].mxu1  ;;  %v133_v56 = vld [vmem:[#allocation12 + $0xf0] sm:$0xff] }
 0x6d1   :  { %v3739_v63 = vsel %vm1065_vm3, %v3738_v49, %v9677_v35  ;;  %v134_v49 = vld [vmem:[#allocation12 + $0xf8] sm:$0xff] }
 0x6d2   :  { %v3408_v3 = vpop.f32.mrb[42].mxu1  ;;  %v3741_v6 = vsel %vm1068_vm4, %v3740_v62, %v3739_v63 }
 0x6d3   :  { %v3742_v47 = vrot.slane %v3408_v3, 5  ;;  %v8472_v4 = vpop.f32.mrb[43].mxu1 }
 0x6d5   :  { %v3743_v10 = vsel %vm1071_vm5, %v3742_v47, %v3741_v6  ;;  %v4003_v6 = vld [vmem:[#allocation6] sm:$0xff]  ;;  %v4157_v47 = vld [vmem:[#allocation11] sm:$0xff] }
 0x6d6   :  { %v3564_v16 = vpop.f32.mrb[44].mxu1  ;;  %v3745_v51 = vsel %vm1074_vm6, %v3744_v8, %v3743_v10 }
 0x6d7   :  { %v3746_v58 = vrot.slane %v3564_v16, 3  ;;  %v8482_v28 = vpop.f32.mrb[45].mxu1  ;;  %v9840_v16 = vld [vmem:[%s10344_s4 + $0x3] ss:$0 sm:$0xff] }
 0x6d9   :  { %v3747_v50 = vsel %vm1077_vm7, %v3746_v58, %v3745_v51 }
 0x6da   :  { %v3720_v11 = vpop.f32.mrb[46].mxu1  ;;  %v3749_v35 = vsel %vm1080_vm8, %v3748_v38, %v3747_v50  ;;  %v7930_v38 = vld [vmem:[%s10346_s6] ss:$0 sm:$0xff] }
 0x6db   :  { %v3750_v21 = vrot.slane %v3720_v11, 1  ;;  %v8492_v46 = vpop.f32.mrb[47].mxu1 }
 0x6dd   :  { %v3751_v53 = vsel %vm1083_vm9, %v3750_v21, %v3749_v35 }
 0x6de   :  { %v3824_v41 = vadd.f32 %v3823_v14, %v3751_v53 }
 0x6e0   :  { %v3827_v26 = vmul.f32 0.25, %v3824_v41 }
 0x6e2   :  { %v3828_v17 = vsel %vm1163_vm10, %v3827_v26, -inf }
 0x6e3   :  { %3829 = vmax.xlane.f32.xlu0 %v3828_v17  ;;  %v9858_v17 = vld [vmem:[#allocation14 + $0x10] sm:$0xff] }
 0x6e7   :  { %2944 = vadd.xlane.f32.xlu0 %v2943_v43 }
 0x770   :  { %v3830_v15 = vpop.xlane.xlu0 %3829 }
 0x771   :  { %v3831_v60 = vsub.f32 %v3827_v26, %v3830_v15 }
 0x773   :  { %v3832_v27 = vmul.f32 1.442695, %v3831_v60 }
 0x774   :  { %v2945_v30 = vpop.xlane.xlu0 %2944 }
 0x775   :  { %8921 = vpow2.f32 %v3832_v27  ;;  %v9868_v27 = vld [vmem:[#allocation14 + $0x18] sm:$0xff] }
 0x776   :  { %8923 = vrcp.f32 %v2945_v30 }
 0x77f   :  { %v8922_v44 = vpop.eup %8921 }
 0x780   :  { %8501 = vmatmul.mubr.msk.f32.vlgmr.msra.gmra.mrb[48].mxu1 %vm1163_vm10, %v8922_v44  ;;  %v3834_v20 = vsel %vm1163_vm10, %v8922_v44, 0.0  ;;  %v8950_v44 = vld [vmem:[%s10344_s4 + $0x1] ss:$0 sm:$0xff] }
 0x781   :  { %3835 = vadd.xlane.f32.xlu0 %v3834_v20  ;;  %8848 = vmatpush3.bf16.msra.mxu1 %v9239_v5  ;;  %v8924_v5 = vpop.eup %8923 }
 0x782   :  { %8849 = vmatprep.subr.bf16.mxu1 %v9103_v0  ;;  %8538 = vmatprep.mubr.msk.f32.mxu1 %vm9104_vm0, %v9105_v1  ;;  %v3024_v34 = vmul.f32 %v8924_v5, %v3020_v52  ;;  %v132_v52 = vld [vmem:[#allocation12 + $0xe8] sm:$0xff] }
 0x783   :  { %v9784_v54 = vpack.c.bf16 %v132_v52, %v131_v48 }
 0x785   :  { %1171 = vadd.xlane.f32.xlu0 %v1170_v37  ;;  %8851 = vmatpush3.bf16.msra.mxu1 %v9244_v12  ;;  %v128_v12 = vld [vmem:[#allocation12 + $0xc8] sm:$0xff] }
 0x786   :  { %8852 = vmatprep.subr.bf16.mxu1 %v9103_v0  ;;  %v9772_v45 = vpack.c.bf16 %v128_v12, %v127_v40  ;;  %v9892_v12 = vld [vmem:[#allocation14 + $0x28] sm:$0xff] }
 0x788   :  { %8836 = vmatpush3.bf16.msra.mxu0 %v9772_v45 }
 0x789   :  { %8854 = vmatpush3.bf16.msra.mxu1 %v9252_v18  ;;  %v129_v18 = vld [vmem:[#allocation12 + $0xd0] sm:$0xff]  ;;  %8837 = vmatprep.subr.bf16.mxu0 %v9103_v0 }
 0x78a   :  { %8855 = vmatprep.subr.bf16.mxu1 %v9103_v0 }
 0x78d   :  { %8857 = vmatpush3.bf16.msra.mxu1 %v9260_v24  ;;  %v9775_v24 = vpack.c.bf16 %v130_v2, %v129_v18  ;;  %v9905_v2 = vld [vmem:[#allocation14 + $0x30] sm:$0xff] }
 0x78e   :  { %8870 = vmatprep.subr.bf16.mxu1 %v9103_v0 }
 0x78f   :  { %8839 = vmatpush3.bf16.msra.mxu0 %v9775_v24 }
 0x790   :  { %8840 = vmatprep.subr.bf16.mxu0 %v9103_v0 }
 0x793   :  { %8842 = vmatpush3.bf16.msra.mxu0 %v9784_v54 }
 0x794   :  { %8843 = vmatprep.subr.bf16.mxu0 %v9103_v0 }
 0x79b   :  { %3026 = vrot.lane.b32.xlu0 %v3024_v34, %s9111_s9  ;;  %v9882_v34 = vld [vmem:[#allocation14 + $0x20] sm:$0xff] }
 0x79f   :  { %4082 = vrot.lane.b32.xlu0 %v4080_v23, %s9112_s10 }
 0x80e   :  { %v3836_v22 = vpop.xlane.xlu0 %3835 }
 0x812   :  { %v1172_v32 = vpop.xlane.xlu0 %1171 }
 0x813   :  { %8925 = vrcp.f32 %v1172_v32 }
 0x814   :  { %8927 = vrcp.f32 %v3836_v22 }
 0x816   :  { %v3027_v14 = vpop.permute.xlu0 %3026 }
 0x81d   :  { %v8926_v31 = vpop.eup %8925 }
 0x81e   :  { %v1247_v42 = vmul.f32 %v8926_v31, %v9579_v55  ;;  %v9788_v55 = vpack.c.bf16 %v134_v49, %v133_v56  ;;  %v8928_v61 = vpop.eup %8927  ;;  %v9916_v31 = vld [vmem:[#allocation14 + $0x38] sm:$0xff] }
 0x820   :  { %1248 = vst.msk [vmem:[#allocation5] sm:$0xff] %vm455_vm2, %v1247_v42  ;;  %8845 = vmatpush3.bf16.msra.mxu0 %v9788_v55  ;;  %v7929_v42 = vld [vmem:[%s10345_s5] ss:$0 sm:$0xff] }
 0x821   :  { %2139 = vst.msk [vmem:[#allocation5] sm:$0xff] %vm2138_vm11, %v2136_v59  ;;  %8858 = vmatprep.subr.bf16.mxu0 %v9103_v0 }
 0x822   :  { %3030 = vst.msk [vmem:[#allocation5] sm:$0xff] %vm3029_vm12, %v3027_v14 }
 0x853   :  { %v3911_v62 = vpop.f32.mrb[48].mxu1 }
 0x854   :  { %v3915_v63 = vmul.f32 %v8928_v61, %v3911_v62  ;;  %v8502_v3 = vpop.f32.mrb[49].mxu1 }
 0x856   :  { %3917 = vrot.lane.b32.xlu1 %v3915_v63, %s9113_s11  ;;  %v8955_v63 = vld [vmem:[%s10344_s4 + $0x2] ss:$0 sm:$0xff] }
 0x85a   :  { %4005 = vrot.lane.b32.xlu1 %v4003_v6, %s9112_s10 }
 0x85e   :  { %4159 = vrot.lane.b32.xlu1 %v4157_v47, %s9112_s10 }
 0x8c8   :  { %v3918_v4 = vpop.permute.xlu1 %3917 }
 0x8c9   :  { %3921 = vst.msk [vmem:[#allocation5] sm:$0xff] %vm3920_vm13, %v3918_v4 }
 0x8cc   :  { %v4006_v8 = vpop.permute.xlu1 %4005 }
 0x8cd   :  { %8539 = vmatmul.mubr.msk.f32.vlgmr.msra.gmra.mrb[50].mxu1 %vm149_vm1, %v4006_v8 }
 0x8ce   :  { %8872 = vmatpush3.bf16.msra.mxu1 %v9268_v29  ;;  %8576 = vmatprep.mubr.msk.f32.mxu1 %vm9104_vm0, %v9105_v1  ;;  %v9827_v29 = vld [vmem:[#allocation14 + $0x8] sm:$0xff] }
 0x8cf   :  { %8873 = vmatprep.subr.bf16.mxu1 %v9103_v0 }
 0x8d0   :  { %v3922_v10 = vld [vmem:[#allocation5] sm:$0xff] }
 0x8d1   :  { %8520 = vmatmul.mubr.msk.f32.vlgmr.msra.gmra.mrb[36].mxu0 %vm149_vm1, %v3922_v10 }
 0x8d2   :  { %8860 = vmatpush3.bf16.msra.mxu0 %v9241_v9  ;;  %8557 = vmatprep.mubr.msk.f32.mxu0 %vm9104_vm0, %v9105_v1  ;;  %v4083_v9 = vpop.permute.xlu0 %4082 }
 0x8d3   :  { %8861 = vmatprep.subr.bf16.mxu0 %v9103_v0  ;;  %8875 = vmatpush3.bf16.msra.mxu1 %v9276_v33  ;;  %v8947_v33 = vld [vmem:[%s10344_s4] ss:$0 sm:$0xff]  ;;  %s9114_s4 = smov [#allocation15]  }
 0x8d4   :  { %8876 = vmatprep.subr.bf16.mxu1 %v9103_v0  ;;  %s7820_s7 = sshll.u32 %s9114_s4, 4  ;;  %s7821_s7 = int_to_ptr.vmem [resolvable:$true] %s7820_s7 }
 0x8d5   :  { %s9066_s1 = scalar_lea.vmem %s7821_s7, 128  ;;  %p9071_p13 = scmp.lt.s32.totalorder %s7821_s7, %s7821_s7 }
 0x8d6   :  { %8863 = vmatpush3.bf16.msra.mxu0 %v9248_v13  ;;  %v9821_v13 = vld [vmem:[#allocation14] sm:$0xff]  ;;  %p9067_p12 = scmp.ne.s32.totalorder %s7821_s7, %s9066_s1  ;;  %p9072_p0 = scmp.lt.s32.totalorder %s9066_s1, %s9066_s1 }
 0x8d7   :  { %8864 = vmatprep.subr.bf16.mxu0 %v9103_v0  ;;  %8878 = vmatpush3.bf16.msra.mxu1 %v9284_v36 }
 0x8d8   :  { %8879 = vmatprep.subr.bf16.mxu1 %v9103_v0  ;;  %p9073_p1 = por %p9072_p0, %p9071_p13 }
 0x8da   :  { %8866 = vmatpush3.bf16.msra.mxu0 %v9256_v19  ;;  %v4160_v19 = vpop.permute.xlu1 %4159  ;;  %p9074_p2 = pnand %p9073_p1, %p9067_p12 }
 0x8db   :  { %8867 = vmatprep.subr.bf16.mxu0 %v9103_v0  ;;  %8881 = vmatpush3.bf16.msra.mxu1 %v9288_v39 }
 0x8dc   :  { %8584 = vmatprep.subr.mxu1 %v9105_v1 }
 0x8de   :  { %8869 = vmatpush3.bf16.msra.mxu0 %v9264_v25  ;;  %8577 = vmatmul.mubr.msk.f32.vlgmr.msra.gmra.mrb[52].mxu1 %vm149_vm1, %v4160_v19 }
 0x8df   :  { %8579 = vmatprep.subr.mxu0 %v9105_v1  ;;  %8586 = vmatprep.mubr.msk.f32.mxu1 %vm9104_vm0, %v9105_v1 }
 0x8e1   :  { %8558 = vmatmul.mubr.msk.f32.vlgmr.msra.gmra.mrb[38].mxu0 %vm149_vm1, %v4083_v9 }
 0x8e2   :  { %8581 = vmatprep.mubr.msk.f32.mxu0 %vm9104_vm0, %v9105_v1 }
 0x8e4   :  { %8585 = vmatpush3.xpose.msk.msra.mxu1 %vm455_vm2, %v9827_v29 }
 0x8e5   :  { %8594 = vmatprep.subr.mxu1 %v9105_v1 }
 0x8e7   :  { %8580 = vmatpush3.xpose.msk.msra.mxu0 %vm455_vm2, %v9821_v13 }
 0x8e8   :  { %8589 = vmatprep.subr.mxu0 %v9105_v1 }
 0x9a0   :  { %v4075_v25 = vpop.f32.mrb[50].mxu1 }
 0x9a1   :  { %v4076_v36 = vadd.f32 %v8947_v33, %v4075_v25  ;;  %v8540_v39 = vpop.f32.mrb[51].mxu1 }
 0x9a3   :  { %4079 = vst.msk [vmem:[#allocation2] sm:$0xff] %vm149_vm1, %v4076_v36 }
 0x9a4   :  { %v3998_v51 = vpop.f32.mrb[36].mxu0 }
 0x9a5   :  { %v3999_v58 = vadd.f32 %v9840_v16, %v3998_v51  ;;  %v8521_v28 = vpop.f32.mrb[37].mxu0 }
 0x9a7   :  { %4002 = vst.msk [vmem:[#allocation15] sm:$0xff] %vm149_vm1, %v3999_v58 }
 0x9aa   :  { %v9848_v50 = vld [vmem:[#allocation2] sm:$0xff] }
 0x9ab   :  { %v4252_v11 = vadd.f32 %v7930_v38, %v9848_v50  ;;  %v9940_v48 = vadd.f32 %v7929_v42, %v9848_v50 }
 0x9ad   :  { %v4261_v35 = vrot.slane %v4252_v11, %v9315_v57  ;;  %v4254_v21 = vcombine.high %v4252_v11, %v4252_v11 }
 0x9af   :  { %v4277_v46 = vrot.slane %v4261_v35, %v9315_v57  ;;  %v4269_v53 = vcombine.high %v4261_v35, %v4261_v35  ;;  %v4268_v43 = vrot.slane %v4254_v21, %v9315_v57 }
 0x9b1   :  { %8582 = vmatmul.mubr.msk.f32.vlgmr.msra.gmra.mrb[40].mxu0 %vm455_vm2, %v4277_v46  ;;  %v9855_v41 = vrot.slane %v4277_v46, %v9339_v7  ;;  %v4291_v26 = vrot.slane %v4269_v53, %v9315_v57  ;;  %v4299_v15 = vcombine.high %v4277_v46, %v4277_v46  ;;  %v4270_v23 = vcombine.high %v4268_v43, %v4268_v43  ;;  %v4229_v62 = vpop.f32.mrb[52].mxu1 }
 0x9b2   :  { %8590 = vmatpush3.xpose.msk.msra.mxu0 %vm455_vm2, %v9858_v17  ;;  %8591 = vmatprep.mubr.msk.f32.mxu0 %vm9104_vm0, %v9105_v1  ;;  %v4284_v40 = vrot.slane %v4268_v43, %v9315_v57  ;;  %v4230_v3 = vadd.f32 %v8955_v63, %v4229_v62  ;;  %v8578_v6 = vpop.f32.mrb[53].mxu1 }
 0x9b3   :  { %5137 = vrot.lane.b32.xlu1 %v9855_v41, %s9107_s26  ;;  %8587 = vmatmul.mubr.msk.f32.vlgmr.msra.gmra.mrb[54].mxu1 %vm455_vm2, %v4291_v26  ;;  %v9880_v30 = vrot.slane %v4291_v26, %v9339_v7  ;;  %v4301_v5 = vcombine.high %v4291_v26, %v4291_v26  ;;  %v9901_v18 = vrot.slane %v4299_v15, %v9339_v7 }
 0x9b4   :  { %v4152_v60 = vpop.f32.mrb[38].mxu0  ;;  %8595 = vmatpush3.xpose.msk.msra.mxu1 %vm455_vm2, %v9868_v27  ;;  %8599 = vmatprep.subr.mxu0 %v9105_v1  ;;  %v4298_v22 = vrot.slane %v4270_v23, %v9315_v57  ;;  %v4300_v32 = vcombine.high %v4284_v40, %v4284_v40  ;;  %v9943_v52 = vrot.slane %v4284_v40, %v9339_v7 }
 0x9b5   :  { %v4153_v20 = vadd.f32 %v8950_v44, %v4152_v60  ;;  %v8559_v37 = vpop.f32.mrb[39].mxu0  ;;  %8592 = vmatmul.mubr.msk.f32.vlgmr.msra.gmra.mrb[42].mxu0 %vm455_vm2, %v4299_v15  ;;  %8596 = vmatprep.mubr.msk.f32.mxu1 %vm9104_vm0, %v9105_v1  ;;  %v9922_v57 = vrot.slane %v4301_v5, %v9339_v7  ;;  %4233 = vst.msk [vmem:[#allocation4] sm:$0xff] %vm149_vm1, %v4230_v3 }
 0x9b6   :  { %8600 = vmatpush3.xpose.msk.msra.mxu0 %vm455_vm2, %v9882_v34  ;;  %8604 = vmatprep.subr.mxu1 %v9105_v1  ;;  %v4302_v14 = vcombine.high %v4298_v22, %v4298_v22  ;;  %v9959_v56 = vrot.slane %v4298_v22, %v9339_v7  ;;  %v9964_v49 = vrot.slane %v4300_v32, %v9339_v7 }
 0x9b7   :  { %4156 = vst.msk [vmem:[#allocation3] sm:$0xff] %vm149_vm1, %v4153_v20  ;;  %5215 = vrot.lane.b32.xlu1 %v9880_v30, %s9107_s26  ;;  %8597 = vmatmul.mubr.msk.f32.vlgmr.msra.gmra.mrb[56].mxu1 %vm455_vm2, %v4301_v5 }
 0x9b8   :  { %8605 = vmatpush3.xpose.msk.msra.mxu1 %vm455_vm2, %v9892_v12  ;;  %8601 = vmatprep.mubr.msk.f32.mxu0 %vm9104_vm0, %v9105_v1  ;;  %v9969_v61 = vrot.slane %v4302_v14, %v9339_v7 }
 0x9b9   :  { %8602 = vmatmul.mubr.msk.f32.vlgmr.msra.gmra.mrb[44].mxu0 %vm455_vm2, %v4284_v40  ;;  %8609 = vmatprep.subr.mxu0 %v9105_v1 }
 0x9ba   :  { %8606 = vmatprep.mubr.msk.f32.mxu1 %vm9104_vm0, %v9105_v1  ;;  %8610 = vmatpush3.xpose.msk.msra.mxu0 %vm455_vm2, %v9905_v2 }
 0x9bb   :  { %8614 = vmatprep.subr.mxu1 %v9105_v1  ;;  %5293 = vrot.lane.b32.xlu1 %v9901_v18, %s9107_s26 }
 0x9bc   :  { %8607 = vmatmul.mubr.msk.f32.vlgmr.msra.gmra.mrb[58].mxu1 %vm455_vm2, %v4298_v22  ;;  %8611 = vmatprep.mubr.msk.f32.mxu0 %vm9104_vm0, %v9105_v1  ;;  %v9979_v47 = vld [vmem:[#allocation4] sm:$0xff] }
 0x9bd   :  { %8615 = vmatpush3.xpose.msk.msra.mxu1 %vm455_vm2, %v9916_v31  ;;  %8612 = vmatmul.mubr.msk.f32.vlgmr.msra.gmra.mrb[46].mxu0 %vm455_vm2, %v4300_v32 }
 0x9be   :  { %8619 = vmatprep.subr.mxu0 %v9105_v1  ;;  %8616 = vmatprep.mubr.msk.f32.mxu1 %vm9104_vm0, %v9105_v1  ;;  %v9930_v59 = vld [vmem:[#allocation3] sm:$0xff] }
 0x9bf   :  { %8620 = vmatpush3.xpose.msk.msra.mxu0 %vm455_vm2, %v9930_v59  ;;  %5371 = vrot.lane.b32.xlu1 %v9922_v57, %s9107_s26 }
 0x9c0   :  { %8617 = vmatmul.mubr.msk.f32.vlgmr.msra.gmra.mrb[60].mxu1 %vm455_vm2, %v4302_v14  ;;  %8621 = vmatprep.mubr.msk.f32.mxu0 %vm9104_vm0, %v9105_v1 }
 0x9c1   :  { %8629 = vmatprep.subr.mxu0 %v9105_v1  ;;  %8624 = vmatprep.subr.mxu1 %v9105_v1 }
 0x9c2   :  { %8622 = vmatmul.mubr.msk.f32.vlgmr.msra.gmra.mrb[48].mxu0 %vm455_vm2, %v9940_v48  ;;  %8626 = vmatprep.mubr.msk.f32.mxu1 %vm9104_vm0, %v9105_v1 }
 0x9c3   :  { %5449 = vrot.lane.b32.xlu1 %v9943_v52, %s9107_s26  ;;  %8630 = vmatpush3.xpose.msk.msra.mxu0 %vm455_vm2, %v9821_v13 }
 0x9c4   :  { %8631 = vmatprep.mubr.msk.f32.mxu0 %vm9104_vm0, %v9105_v1  ;;  %8639 = vmatprep.subr.mxu0 %v9105_v1 }
 0x9c5   :  { %8625 = vmatpush3.msra.mxu1 %v9979_v47 }
 0x9c6   :  { %8634 = vmatprep.subr.mxu1 %v9105_v1 }
 0x9c7   :  { %5527 = vrot.lane.b32.xlu1 %v9959_v56, %s9107_s26 }
 0x9cb   :  { %5605 = vrot.lane.b32.xlu1 %v9964_v49, %s9107_s26 }
 0x9cf   :  { %5683 = vrot.lane.b32.xlu1 %v9969_v61, %s9107_s26 }
 0x9d3   :  { %5758 = vrot.lane.b32.xlu1 %v9940_v48, %s9107_s26 }
 0xa25   :  { %v5138_v7 = vpop.permute.xlu1 %5137 }
 0xa26   :  { %8632 = vmatmul.mubr.msk.f32.vlgmr.msra.gmra.mrb[50].mxu0 %vm455_vm2, %v5138_v7 }
 0xa27   :  { %8640 = vmatpush3.xpose.msk.msra.mxu0 %vm455_vm2, %v9858_v17  ;;  %8641 = vmatprep.mubr.msk.f32.mxu0 %vm9104_vm0, %v9105_v1 }
 0xa28   :  { %8649 = vmatprep.subr.mxu0 %v9105_v1 }
 0xa29   :  { %v9989_v4 = vpop.permute.xlu1 %5215 }
 0xa2d   :  { %v5294_v8 = vpop.permute.xlu1 %5293 }
 0xa2e   :  { %8642 = vmatmul.mubr.msk.f32.vlgmr.msra.gmra.mrb[52].mxu0 %vm455_vm2, %v5294_v8 }
 0xa2f   :  { %8650 = vmatpush3.xpose.msk.msra.mxu0 %vm455_vm2, %v9882_v34  ;;  %8651 = vmatprep.mubr.msk.f32.mxu0 %vm9104_vm0, %v9105_v1 }
 0xa30   :  { %8659 = vmatprep.subr.mxu0 %v9105_v1 }
 0xa31   :  { %v9997_v10 = vpop.permute.xlu1 %5371 }
 0xa35   :  { %v5450_v9 = vpop.permute.xlu1 %5449 }
 0xa36   :  { %8652 = vmatmul.mubr.msk.f32.vlgmr.msra.gmra.mrb[54].mxu0 %vm455_vm2, %v5450_v9 }
 0xa37   :  { %8660 = vmatpush3.xpose.msk.msra.mxu0 %vm455_vm2, %v9905_v2  ;;  %8661 = vmatprep.mubr.msk.f32.mxu0 %vm9104_vm0, %v9105_v1 }
 0xa38   :  { %8669 = vmatprep.subr.mxu0 %v9105_v1 }
 0xa39   :  { %v10005_v19 = vpop.permute.xlu1 %5527 }
 0xa3d   :  { %v5606_v25 = vpop.permute.xlu1 %5605 }
 0xa3e   :  { %8662 = vmatmul.mubr.msk.f32.vlgmr.msra.gmra.mrb[56].mxu0 %vm455_vm2, %v5606_v25 }
 0xa3f   :  { %8671 = vmatprep.mubr.msk.f32.mxu0 %vm9104_vm0, %v9105_v1 }
 0xa84   :  { %v4371_v33 = vpop.f32.mrb[40].mxu0 }
 0xa85   :  { %v8583_v36 = vpop.f32.mrb[41].mxu0 }
 0xa86   :  { %v4443_v39 = vpop.f32.mrb[54].mxu1 }
 0xa87   :  { %v4887_v51 = vrot.slane %v4443_v39, 7  ;;  %v8588_v58 = vpop.f32.mrb[55].mxu1 }
 0xa88   :  { %v4515_v28 = vpop.f32.mrb[42].mxu0  ;;  %v5684_v58 = vpop.permute.xlu1 %5683 }
 0xa89   :  { %v4888_v38 = vsel %vm1065_vm3, %v4887_v51, %v4371_v33  ;;  %v4889_v50 = vrot.slane %v4515_v28, 6  ;;  %v8593_v11 = vpop.f32.mrb[43].mxu0 }
 0xa8a   :  { %v4587_v35 = vpop.f32.mrb[56].mxu1 }
 0xa8b   :  { %v4890_v21 = vsel %vm1068_vm4, %v4889_v50, %v4888_v38  ;;  %v4891_v46 = vrot.slane %v4587_v35, 5  ;;  %v8598_v53 = vpop.f32.mrb[57].mxu1 }
 0xa8c   :  { %v4659_v26 = vpop.f32.mrb[44].mxu0 }
 0xa8d   :  { %v4892_v43 = vsel %vm1071_vm5, %v4891_v46, %v4890_v21  ;;  %v4893_v15 = vrot.slane %v4659_v26, 4  ;;  %v8603_v60 = vpop.f32.mrb[45].mxu0 }
 0xa8f   :  { %v4894_v44 = vsel %vm1074_vm6, %v4893_v15, %v4892_v43  ;;  %v4731_v20 = vpop.f32.mrb[58].mxu1 }
 0xa90   :  { %v4895_v37 = vrot.slane %v4731_v20, 3  ;;  %v8608_v5 = vpop.f32.mrb[59].mxu1  ;;  %v4803_v23 = vpop.f32.mrb[46].mxu0 }
 0xa91   :  { %v4897_v40 = vrot.slane %v4803_v23, 2  ;;  %v8613_v22 = vpop.f32.mrb[47].mxu0 }
 0xa92   :  { %v4896_v32 = vsel %vm1077_vm7, %v4895_v37, %v4894_v44 }
 0xa93   :  { %v4875_v42 = vpop.f32.mrb[60].mxu1  ;;  %v4898_v14 = vsel %vm1080_vm8, %v4897_v40, %v4896_v32 }
 0xa94   :  { %v4899_v62 = vrot.slane %v4875_v42, 1  ;;  %v8618_v63 = vpop.f32.mrb[61].mxu1 }
 0xa95   :  { %v4974_v3 = vpop.f32.mrb[48].mxu0 }
 0xa96   :  { %v4900_v6 = vsel %vm1083_vm9, %v4899_v62, %v4898_v14  ;;  %v8623_v7 = vpop.f32.mrb[49].mxu0 }
 0xa97   :  { %v4975_v8 = vadd.f32 %v4974_v3, %v4900_v6 }
 0xa99   :  { %v4978_v9 = vmul.f32 0.25, %v4975_v8 }
 0xa9b   :  { %v4979_v25 = vsel %vm1163_vm10, %v4978_v9, -inf }
 0xa9c   :  { %4980 = vmax.xlane.f32.xlu0 %v4979_v25 }
 0xab2   :  { %5761 = vrot.lane.b32.xlu0 %v9930_v59, %s9107_s26 }
 0xab6   :  { %5872 = vrot.lane.b32.xlu0 %v9979_v47, %s9107_s26 }
 0xaba   :  { %6027 = vrot.lane.b32.xlu0 %v9855_v41, %s9108_s28 }
 0xabe   :  { %6105 = vrot.lane.b32.xlu0 %v9880_v30, %s9108_s28 }
 0xac2   :  { %6183 = vrot.lane.b32.xlu0 %v9901_v18, %s9108_s28 }
 0xac6   :  { %6261 = vrot.lane.b32.xlu0 %v9922_v57, %s9108_s28 }
 0xaca   :  { %6339 = vrot.lane.b32.xlu0 %v9943_v52, %s9108_s28 }
 0xace   :  { %6495 = vrot.lane.b32.xlu0 %v9964_v49, %s9108_s28 }
 0xad2   :  { %6573 = vrot.lane.b32.xlu0 %v9969_v61, %s9108_s28 }
 0xad6   :  { %6651 = vrot.lane.b32.xlu0 %v9930_v59, %s9108_s28 }
 0xada   :  { %6648 = vrot.lane.b32.xlu0 %v9940_v48, %s9108_s28 }
 0xade   :  { %6762 = vrot.lane.b32.xlu0 %v9979_v47, %s9108_s28 }
 0xae2   :  { %6917 = vrot.lane.b32.xlu0 %v9855_v41, %s9109_s29 }
 0xae6   :  { %6995 = vrot.lane.b32.xlu0 %v9880_v30, %s9109_s29 }
 0xaea   :  { %7073 = vrot.lane.b32.xlu0 %v9901_v18, %s9109_s29 }
 0xaee   :  { %7151 = vrot.lane.b32.xlu0 %v9922_v57, %s9109_s29 }
 0xaf2   :  { %7229 = vrot.lane.b32.xlu0 %v9943_v52, %s9109_s29 }
 0xaf6   :  { %7307 = vrot.lane.b32.xlu0 %v9959_v56, %s9109_s29 }
 0xaf9   :  { %v10054_v33 = vpop.f32.mrb[50].mxu0 }
 0xafa   :  { %7385 = vrot.lane.b32.xlu0 %v9964_v49, %s9109_s29  ;;  %v8633_v41 = vpop.f32.mrb[51].mxu0 }
 0xafe   :  { %7463 = vrot.lane.b32.xlu0 %v9969_v61, %s9109_s29  ;;  %v5759_v61 = vpop.permute.xlu1 %5758 }
 0xb01   :  { %v10060_v30 = vpop.f32.mrb[52].mxu0 }
 0xb02   :  { %7538 = vrot.lane.b32.xlu0 %v9940_v48, %s9109_s29  ;;  %v8643_v18 = vpop.f32.mrb[53].mxu0  ;;  %v5773_v63 = vrot.slane %v10060_v30, 6 }
 0xb09   :  { %v10064_v57 = vpop.f32.mrb[54].mxu0 }
 0xb0a   :  { %v8653_v52 = vpop.f32.mrb[55].mxu0  ;;  %v5777_v41 = vrot.slane %v10064_v57, 4 }
 0xb11   :  { %v10066_v36 = vpop.f32.mrb[56].mxu0 }
 0xb12   :  { %v8663_v39 = vpop.f32.mrb[57].mxu0  ;;  %v5781_v30 = vrot.slane %v10066_v36, 2 }
 0xb29   :  { %v4981_v51 = vpop.xlane.xlu0 %4980 }
 0xb2a   :  { %v4982_v28 = vsub.f32 %v4978_v9, %v4981_v51 }
 0xb2c   :  { %v4983_v49 = vmul.f32 1.442695, %v4982_v28 }
 0xb2d   :  { %v5762_v38 = vpop.permute.xlu0 %5761 }
 0xb2e   :  { %8929 = vpow2.f32 %v4983_v49  ;;  %8670 = vmatpush3.xpose.msk.msra.mxu0 %vm455_vm2, %v5762_v38 }
 0xb2f   :  { %8679 = vmatprep.subr.mxu0 %v9105_v1 }
 0xb31   :  { %8672 = vmatmul.mubr.msk.f32.vlgmr.msra.gmra.mrb[58].mxu0 %vm455_vm2, %v5759_v61  ;;  %v5873_v48 = vpop.permute.xlu0 %5872 }
 0xb32   :  { %8680 = vmatpush3.xpose.msk.msra.mxu0 %vm455_vm2, %v9821_v13  ;;  %8681 = vmatprep.mubr.msk.f32.mxu0 %vm9104_vm0, %v9105_v1 }
 0xb33   :  { %8689 = vmatprep.subr.mxu0 %v9105_v1 }
 0xb35   :  { %v6028_v50 = vpop.permute.xlu0 %6027 }
 0xb36   :  { %8682 = vmatmul.mubr.msk.f32.vlgmr.msra.gmra.mrb[60].mxu0 %vm455_vm2, %v6028_v50 }
 0xb37   :  { %8690 = vmatpush3.xpose.msk.msra.mxu0 %vm455_vm2, %v9858_v17  ;;  %8691 = vmatprep.mubr.msk.f32.mxu0 %vm9104_vm0, %v9105_v1 }
 0xb38   :  { %v10081_v11 = vpop.eup %8929  ;;  %8699 = vmatprep.subr.mxu0 %v9105_v1 }
 0xb39   :  { %8627 = vmatmul.mubr.msk.f32.vlgmr.msra.gmra.mrb[62].mxu1 %vm1163_vm10, %v10081_v11  ;;  %v10086_v35 = vpop.permute.xlu0 %6105 }
 0xb3a   :  { %8635 = vmatpush3.xpose.msk.msra.mxu1 %vm455_vm2, %v9827_v29  ;;  %8636 = vmatprep.mubr.msk.f32.mxu1 %vm9104_vm0, %v9105_v1 }
 0xb3b   :  { %8644 = vmatprep.subr.mxu1 %v9105_v1 }
 0xb3d   :  { %8637 = vmatmul.mubr.msk.f32.vlgmr.msra.gmra.mrb[64].mxu1 %vm455_vm2, %v9989_v4  ;;  %v6184_v21 = vpop.permute.xlu0 %6183 }
 0xb3e   :  { %8645 = vmatpush3.xpose.msk.msra.mxu1 %vm455_vm2, %v9868_v27  ;;  %8692 = vmatmul.mubr.msk.f32.vlgmr.msra.gmra.mrb[62].mxu0 %vm455_vm2, %v6184_v21 }
 0xb3f   :  { %8646 = vmatprep.mubr.msk.f32.mxu1 %vm9104_vm0, %v9105_v1  ;;  %8654 = vmatprep.subr.mxu1 %v9105_v1 }
 0xb40   :  { %8700 = vmatpush3.xpose.msk.msra.mxu0 %vm455_vm2, %v9882_v34  ;;  %8701 = vmatprep.mubr.msk.f32.mxu0 %vm9104_vm0, %v9105_v1 }
 0xb41   :  { %8647 = vmatmul.mubr.msk.f32.vlgmr.msra.gmra.mrb[66].mxu1 %vm455_vm2, %v9997_v10  ;;  %v10107_v4 = vpop.permute.xlu0 %6261  ;;  %8709 = vmatprep.subr.mxu0 %v9105_v1 }
 0xb42   :  { %8655 = vmatpush3.xpose.msk.msra.mxu1 %vm455_vm2, %v9892_v12  ;;  %8656 = vmatprep.mubr.msk.f32.mxu1 %vm9104_vm0, %v9105_v1 }
 0xb43   :  { %8664 = vmatprep.subr.mxu1 %v9105_v1 }
 0xb45   :  { %8657 = vmatmul.mubr.msk.f32.vlgmr.msra.gmra.mrb[68].mxu1 %vm455_vm2, %v10005_v19  ;;  %v6340_v46 = vpop.permute.xlu0 %6339 }
 0xb46   :  { %8665 = vmatpush3.xpose.msk.msra.mxu1 %vm455_vm2, %v9916_v31  ;;  %8702 = vmatmul.mubr.msk.f32.vlgmr.msra.gmra.mrb[64].mxu0 %vm455_vm2, %v6340_v46 }
 0xb47   :  { %8710 = vmatpush3.xpose.msk.msra.mxu0 %vm455_vm2, %v9905_v2  ;;  %8666 = vmatprep.mubr.msk.f32.mxu1 %vm9104_vm0, %v9105_v1 }
 0xb48   :  { %8674 = vmatprep.subr.mxu1 %v9105_v1  ;;  %8711 = vmatprep.mubr.msk.f32.mxu0 %vm9104_vm0, %v9105_v1 }
 0xb49   :  { %8667 = vmatmul.mubr.msk.f32.vlgmr.msra.gmra.mrb[70].mxu1 %vm455_vm2, %v5684_v58  ;;  %v6496_v10 = vpop.permute.xlu0 %6495  ;;  %8719 = vmatprep.subr.mxu0 %v9105_v1 }
 0xb4a   :  { %8675 = vmatpush3.msra.mxu1 %v5873_v48  ;;  %8712 = vmatmul.mubr.msk.f32.vlgmr.msra.gmra.mrb[66].mxu0 %vm455_vm2, %v6496_v10 }
 0xb4b   :  { %8721 = vmatprep.mubr.msk.f32.mxu0 %vm9104_vm0, %v9105_v1  ;;  %8676 = vmatprep.mubr.msk.f32.mxu1 %vm9104_vm0, %v9105_v1 }
 0xb4c   :  { %8684 = vmatprep.subr.mxu1 %v9105_v1 }
 0xb4d   :  { %v10135_v19 = vpop.permute.xlu0 %6573 }
 0xb51   :  { %v6652_v53 = vpop.permute.xlu0 %6651 }
 0xb52   :  { %8720 = vmatpush3.xpose.msk.msra.mxu0 %vm455_vm2, %v6652_v53 }
 0xb53   :  { %8729 = vmatprep.subr.mxu0 %v9105_v1 }
 0xb55   :  { %v6649_v26 = vpop.permute.xlu0 %6648 }
 0xb56   :  { %8722 = vmatmul.mubr.msk.f32.vlgmr.msra.gmra.mrb[68].mxu0 %vm455_vm2, %v6649_v26 }
 0xb57   :  { %8730 = vmatpush3.xpose.msk.msra.mxu0 %vm455_vm2, %v9821_v13  ;;  %8731 = vmatprep.mubr.msk.f32.mxu0 %vm9104_vm0, %v9105_v1 }
 0xb58   :  { %8739 = vmatprep.subr.mxu0 %v9105_v1 }
 0xb59   :  { %v10145_v43 = vpop.permute.xlu0 %6762 }
 0xb5d   :  { %v6918_v15 = vpop.permute.xlu0 %6917 }
 0xb5e   :  { %8732 = vmatmul.mubr.msk.f32.vlgmr.msra.gmra.mrb[70].mxu0 %vm455_vm2, %v6918_v15 }
 0xb5f   :  { %8740 = vmatpush3.xpose.msk.msra.mxu0 %vm455_vm2, %v9858_v17  ;;  %8741 = vmatprep.mubr.msk.f32.mxu0 %vm9104_vm0, %v9105_v1 }
 0xb60   :  { %8749 = vmatprep.subr.mxu0 %v9105_v1 }
 0xb61   :  { %v10153_v60 = vpop.permute.xlu0 %6995 }
 0xb65   :  { %v7074_v13 = vpop.permute.xlu0 %7073 }
 0xb66   :  { %8742 = vmatmul.mubr.msk.f32.vlgmr.msra.gmra.mrb[72].mxu0 %vm455_vm2, %v7074_v13 }
 0xb67   :  { %8750 = vmatpush3.xpose.msk.msra.mxu0 %vm455_vm2, %v9882_v34  ;;  %8751 = vmatprep.mubr.msk.f32.mxu0 %vm9104_vm0, %v9105_v1 }
 0xb68   :  { %8759 = vmatprep.subr.mxu0 %v9105_v1 }
 0xb69   :  { %v10161_v44 = vpop.permute.xlu0 %7151 }
 0xb6d   :  { %v7230_v17 = vpop.permute.xlu0 %7229 }
 0xb6e   :  { %8752 = vmatmul.mubr.msk.f32.vlgmr.msra.gmra.mrb[74].mxu0 %vm455_vm2, %v7230_v17 }
 0xb6f   :  { %8760 = vmatpush3.xpose.msk.msra.mxu0 %vm455_vm2, %v9905_v2  ;;  %8761 = vmatprep.mubr.msk.f32.mxu0 %vm9104_vm0, %v9105_v1 }
 0xb70   :  { %8769 = vmatprep.subr.mxu0 %v9105_v1 }
 0xb71   :  { %v10169_v20 = vpop.permute.xlu0 %7307 }
 0xb75   :  { %v7386_v34 = vpop.permute.xlu0 %7385 }
 0xb76   :  { %8762 = vmatmul.mubr.msk.f32.vlgmr.msra.gmra.mrb[76].mxu0 %vm455_vm2, %v7386_v34 }
 0xb77   :  { %8771 = vmatprep.mubr.msk.f32.mxu0 %vm9104_vm0, %v9105_v1 }
 0xc04   :  { %v5856_v37 = vpop.f32.mrb[58].mxu0 }
 0xc05   :  { %v8673_v5 = vpop.f32.mrb[59].mxu0 }
 0xc09   :  { %v10174_v23 = vpop.f32.mrb[60].mxu0 }
 0xc0a   :  { %v8683_v40 = vpop.f32.mrb[61].mxu0 }
 0xc0c   :  { %v10176_v22 = vpop.f32.mrb[62].mxu1 }
 0xc0d   :  { %v8628_v2 = vpop.f32.mrb[63].mxu1 }
 0xc10   :  { %v5285_v32 = vpop.f32.mrb[64].mxu1 }
 0xc11   :  { %v5771_v42 = vrot.slane %v5285_v32, 7  ;;  %v8638_v14 = vpop.f32.mrb[65].mxu1  ;;  %v10178_v62 = vpop.f32.mrb[62].mxu0 }
 0xc12   :  { %v8693_v3 = vpop.f32.mrb[63].mxu0 }
 0xc13   :  { %v5772_v6 = vsel %vm1065_vm3, %v5771_v42, %v10054_v33 }
 0xc14   :  { %v5441_v7 = vpop.f32.mrb[66].mxu1  ;;  %v5774_v8 = vsel %vm1068_vm4, %v5773_v63, %v5772_v6 }
 0xc15   :  { %v5775_v9 = vrot.slane %v5441_v7, 5  ;;  %v8648_v25 = vpop.f32.mrb[67].mxu1 }
 0xc17   :  { %v5776_v18 = vsel %vm1071_vm5, %v5775_v9, %v5774_v8  ;;  %v6663_v9 = vrot.slane %v10178_v62, 6 }
 0xc18   :  { %v5597_v52 = vpop.f32.mrb[68].mxu1  ;;  %v5778_v39 = vsel %vm1074_vm6, %v5777_v41, %v5776_v18 }
 0xc19   :  { %v5779_v51 = vrot.slane %v5597_v52, 3  ;;  %v8658_v58 = vpop.f32.mrb[69].mxu1  ;;  %v10187_v28 = vpop.f32.mrb[64].mxu0 }
 0xc1a   :  { %v8703_v49 = vpop.f32.mrb[65].mxu0  ;;  %v6667_v52 = vrot.slane %v10187_v28, 4 }
 0xc1b   :  { %v5780_v33 = vsel %vm1077_vm7, %v5779_v51, %v5778_v39 }
 0xc1c   :  { %v5753_v38 = vpop.f32.mrb[70].mxu1  ;;  %v5782_v61 = vsel %vm1080_vm8, %v5781_v30, %v5780_v33 }
 0xc1d   :  { %v5783_v48 = vrot.slane %v5753_v38, 1  ;;  %v8668_v50 = vpop.f32.mrb[71].mxu1  ;;  %v10192_v57 = vpop.f32.mrb[66].mxu0 }
 0xc1e   :  { %v8713_v21 = vpop.f32.mrb[67].mxu0  ;;  %v6671_v33 = vrot.slane %v10192_v57, 2 }
 0xc1f   :  { %v5784_v46 = vsel %vm1083_vm9, %v5783_v48, %v5782_v61 }
 0xc20   :  { %v5857_v10 = vadd.f32 %v5856_v37, %v5784_v46 }
 0xc22   :  { %v5860_v53 = vmul.f32 0.25, %v5857_v10 }
 0xc24   :  { %v5861_v26 = vsel %vm1163_vm10, %v5860_v53, -inf }
 0xc25   :  { %5862 = vmax.xlane.f32.xlu1 %v5861_v26 }
 0xc29   :  { %v6746_v15 = vpop.f32.mrb[68].mxu0 }
 0xc2a   :  { %v8723_v36 = vpop.f32.mrb[69].mxu0 }
 0xc31   :  { %v10196_v13 = vpop.f32.mrb[70].mxu0 }
 0xc32   :  { %v8733_v17 = vpop.f32.mrb[71].mxu0 }
 0xc36   :  { %6417 = vrot.lane.b32.xlu1 %v9959_v56, %s9108_s28 }
 0xc39   :  { %v10200_v34 = vpop.f32.mrb[72].mxu0 }
 0xc3a   :  { %v8743_v5 = vpop.f32.mrb[73].mxu0 }
 0xc41   :  { %v10202_v40 = vpop.f32.mrb[74].mxu0 }
 0xc42   :  { %v8753_v2 = vpop.f32.mrb[75].mxu0 }
 0xc43   :  { %v7557_v2 = vrot.slane %v10202_v40, 4 }
 0xc49   :  { %v10204_v32 = vpop.f32.mrb[76].mxu0 }
 0xc4a   :  { %v8763_v37 = vpop.f32.mrb[77].mxu0 }
 0xcb2   :  { %v5863_v42 = vpop.xlane.xlu1 %5862 }
 0xcb3   :  { %v5864_v14 = vsub.f32 %v5860_v53, %v5863_v42  ;;  %v7464_v53 = vpop.permute.xlu0 %7463 }
 0xcb5   :  { %v5865_v63 = vmul.f32 1.442695, %v5864_v14 }
 0xcb6   :  { %v6418_v56 = vpop.permute.xlu1 %6417 }
 0xcb7   :  { %8931 = vpow2.f32 %v5865_v63 }
 0xcc1   :  { %v8932_v3 = vpop.eup %8931 }
 0xcc2   :  { %8677 = vmatmul.mubr.msk.f32.vlgmr.msra.gmra.mrb[72].mxu1 %vm1163_vm10, %v8932_v3  ;;  %v5867_v57 = vsel %vm1163_vm10, %v8932_v3, 0.0  ;;  %v7561_v3 = vrot.slane %v10204_v32, 2 }
 0xcc3   :  { %8685 = vmatpush3.xpose.msk.msra.mxu1 %vm455_vm2, %v9827_v29  ;;  %8686 = vmatprep.mubr.msk.f32.mxu1 %vm9104_vm0, %v9105_v1 }
 0xcc4   :  { %8694 = vmatprep.subr.mxu1 %v9105_v1 }
 0xcc6   :  { %8687 = vmatmul.mubr.msk.f32.vlgmr.msra.gmra.mrb[74].mxu1 %vm455_vm2, %v10086_v35 }
 0xcc7   :  { %8695 = vmatpush3.xpose.msk.msra.mxu1 %vm455_vm2, %v9868_v27  ;;  %8696 = vmatprep.mubr.msk.f32.mxu1 %vm9104_vm0, %v9105_v1 }
 0xcc8   :  { %8704 = vmatprep.subr.mxu1 %v9105_v1 }
 0xcca   :  { %8697 = vmatmul.mubr.msk.f32.vlgmr.msra.gmra.mrb[76].mxu1 %vm455_vm2, %v10107_v4 }
 0xccb   :  { %8705 = vmatpush3.xpose.msk.msra.mxu1 %vm455_vm2, %v9892_v12  ;;  %8706 = vmatprep.mubr.msk.f32.mxu1 %vm9104_vm0, %v9105_v1 }
 0xccc   :  { %8714 = vmatprep.subr.mxu1 %v9105_v1 }
 0xcce   :  { %8707 = vmatmul.mubr.msk.f32.vlgmr.msra.gmra.mrb[78].mxu1 %vm455_vm2, %v6418_v56 }
 0xccf   :  { %8715 = vmatpush3.xpose.msk.msra.mxu1 %vm455_vm2, %v9916_v31  ;;  %8716 = vmatprep.mubr.msk.f32.mxu1 %vm9104_vm0, %v9105_v1 }
 0xcd0   :  { %8724 = vmatprep.subr.mxu1 %v9105_v1 }
 0xcd2   :  { %8717 = vmatmul.mubr.msk.f32.vlgmr.msra.gmra.mrb[80].mxu1 %vm455_vm2, %v10135_v19 }
 0xcd3   :  { %8725 = vmatpush3.msra.mxu1 %v10145_v43  ;;  %8726 = vmatprep.mubr.msk.f32.mxu1 %vm9104_vm0, %v9105_v1 }
 0xcd4   :  { %8734 = vmatprep.subr.mxu1 %v9105_v1 }
 0xd95   :  { %v10238_v35 = vpop.f32.mrb[72].mxu1 }
 0xd96   :  { %v8678_v4 = vpop.f32.mrb[73].mxu1 }
 0xd99   :  { %v6175_v6 = vpop.f32.mrb[74].mxu1 }
 0xd9a   :  { %v6661_v7 = vrot.slane %v6175_v6, 7  ;;  %v8688_v8 = vpop.f32.mrb[75].mxu1 }
 0xd9c   :  { %v6662_v25 = vsel %vm1065_vm3, %v6661_v7, %v10174_v23 }
 0xd9d   :  { %v6331_v41 = vpop.f32.mrb[76].mxu1  ;;  %v6664_v19 = vsel %vm1068_vm4, %v6663_v9, %v6662_v25 }
 0xd9e   :  { %v6665_v43 = vrot.slane %v6331_v41, 5  ;;  %v8698_v18 = vpop.f32.mrb[77].mxu1 }
 0xda0   :  { %v6666_v39 = vsel %vm1071_vm5, %v6665_v43, %v6664_v19 }
 0xda1   :  { %v6487_v51 = vpop.f32.mrb[78].mxu1  ;;  %v6668_v58 = vsel %vm1074_vm6, %v6667_v52, %v6666_v39 }
 0xda2   :  { %v6669_v30 = vrot.slane %v6487_v51, 3  ;;  %v8708_v49 = vpop.f32.mrb[79].mxu1 }
 0xda4   :  { %v6670_v62 = vsel %vm1077_vm7, %v6669_v30, %v6668_v58  ;;  %v4985_v58 = vsel %vm1163_vm10, %v10081_v11, 0.0 }
 0xda5   :  { %v6643_v38 = vpop.f32.mrb[80].mxu1  ;;  %v6672_v23 = vsel %vm1080_vm8, %v6671_v33, %v6670_v62 }
 0xda6   :  { %v6673_v61 = vrot.slane %v6643_v38, 1  ;;  %v8718_v48 = vpop.f32.mrb[81].mxu1 }
 0xda8   :  { %v6674_v50 = vsel %vm1083_vm9, %v6673_v61, %v6672_v23 }
 0xda9   :  { %v6747_v21 = vadd.f32 %v6746_v15, %v6674_v50  ;;  %v7539_v15 = vpop.permute.xlu0 %7538 }
 0xdab   :  { %v6750_v28 = vmul.f32 0.25, %v6747_v21 }
 0xdad   :  { %v6751_v46 = vsel %vm1163_vm10, %v6750_v28, -inf }
 0xdae   :  { %6752 = vmax.xlane.f32.xlu1 %v6751_v46 }
 0xdbf   :  { %7541 = vrot.lane.b32.xlu1 %v9930_v59, %s9109_s29 }
 0xdc3   :  { %7652 = vrot.lane.b32.xlu1 %v9979_v47, %s9109_s29 }
 0xde7   :  { %5868 = vadd.xlane.f32.xlu1 %v5867_v57 }
 0xe3b   :  { %v6753_v10 = vpop.xlane.xlu1 %6752 }
 0xe3c   :  { %v6754_v26 = vsub.f32 %v6750_v28, %v6753_v10 }
 0xe3e   :  { %v6755_v36 = vmul.f32 1.442695, %v6754_v26 }
 0xe3f   :  { %v7542_v17 = vpop.permute.xlu1 %7541 }
 0xe40   :  { %8933 = vpow2.f32 %v6755_v36  ;;  %8770 = vmatpush3.xpose.msk.msra.mxu0 %vm455_vm2, %v7542_v17 }
 0xe41   :  { %8882 = vmatprep.subr.bf16.mxu0 %v9103_v0 }
 0xe43   :  { %8772 = vmatmul.mubr.msk.f32.vlgmr.msra.gmra.mrb[78].mxu0 %vm455_vm2, %v7539_v15 }
 0xe44   :  { %8884 = vmatpush3.bf16.msra.mxu0 %v9772_v45  ;;  %8795 = vmatprep.mubr.msk.f32.mxu0 %vm9104_vm0, %v9105_v1 }
 0xe45   :  { %8885 = vmatprep.subr.bf16.mxu0 %v9103_v0 }
 0xe48   :  { %8887 = vmatpush3.bf16.msra.mxu0 %v9775_v24 }
 0xe49   :  { %8888 = vmatprep.subr.bf16.mxu0 %v9103_v0 }
 0xe4a   :  { %v8934_v59 = vpop.eup %8933 }
 0xe4b   :  { %8727 = vmatmul.mubr.msk.f32.vlgmr.msra.gmra.mrb[82].mxu1 %vm1163_vm10, %v8934_v59  ;;  %v6757_v25 = vsel %vm1163_vm10, %v8934_v59, 0.0 }
 0xe4c   :  { %8735 = vmatpush3.xpose.msk.msra.mxu1 %vm455_vm2, %v9827_v29  ;;  %8736 = vmatprep.mubr.msk.f32.mxu1 %vm9104_vm0, %v9105_v1 }
 0xe4d   :  { %8744 = vmatprep.subr.mxu1 %v9105_v1  ;;  %8890 = vmatpush3.bf16.msra.mxu0 %v9784_v54 }
 0xe4e   :  { %8891 = vmatprep.subr.bf16.mxu0 %v9103_v0  ;;  %v7653_v0 = vpop.permute.xlu1 %7652 }
 0xe4f   :  { %8737 = vmatmul.mubr.msk.f32.vlgmr.msra.gmra.mrb[84].mxu1 %vm455_vm2, %v10153_v60 }
 0xe50   :  { %8745 = vmatpush3.xpose.msk.msra.mxu1 %vm455_vm2, %v9868_v27  ;;  %8746 = vmatprep.mubr.msk.f32.mxu1 %vm9104_vm0, %v9105_v1 }
 0xe51   :  { %8754 = vmatprep.subr.mxu1 %v9105_v1  ;;  %8893 = vmatpush3.bf16.msra.mxu0 %v9788_v55 }
 0xe53   :  { %8747 = vmatmul.mubr.msk.f32.vlgmr.msra.gmra.mrb[86].mxu1 %vm455_vm2, %v10161_v44 }
 0xe54   :  { %8755 = vmatpush3.xpose.msk.msra.mxu1 %vm455_vm2, %v9892_v12  ;;  %8756 = vmatprep.mubr.msk.f32.mxu1 %vm9104_vm0, %v9105_v1 }
 0xe55   :  { %8764 = vmatprep.subr.mxu1 %v9105_v1 }
 0xe57   :  { %8757 = vmatmul.mubr.msk.f32.vlgmr.msra.gmra.mrb[88].mxu1 %vm455_vm2, %v10169_v20 }
 0xe58   :  { %8765 = vmatpush3.xpose.msk.msra.mxu1 %vm455_vm2, %v9916_v31  ;;  %8766 = vmatprep.mubr.msk.f32.mxu1 %vm9104_vm0, %v9105_v1  ;;  %v7553_v31 = vrot.slane %v10200_v34, 6 }
 0xe59   :  { %8774 = vmatprep.subr.mxu1 %v9105_v1 }
 0xe5b   :  { %8767 = vmatmul.mubr.msk.f32.vlgmr.msra.gmra.mrb[90].mxu1 %vm455_vm2, %v7464_v53 }
 0xe5c   :  { %8775 = vmatpush3.msra.mxu1 %v7653_v0  ;;  %8776 = vmatprep.mubr.msk.f32.mxu1 %vm9104_vm0, %v9105_v1 }
 0xe74   :  { %v5869_v30 = vpop.xlane.xlu1 %5868 }
 0xf16   :  { %v7636_v45 = vpop.f32.mrb[78].mxu0 }
 0xf17   :  { %v8773_v24 = vpop.f32.mrb[79].mxu0 }
 0xf1e   :  { %v6834_v54 = vpop.f32.mrb[82].mxu1 }
 0xf1f   :  { %v8728_v55 = vpop.f32.mrb[83].mxu1 }
 0xf22   :  { %v7065_v29 = vpop.f32.mrb[84].mxu1 }
 0xf23   :  { %v7551_v27 = vrot.slane %v7065_v29, 7  ;;  %v8738_v12 = vpop.f32.mrb[85].mxu1 }
 0xf25   :  { %v7552_v47 = vsel %vm1065_vm3, %v7551_v27, %v10196_v13 }
 0xf26   :  { %v7221_v60 = vpop.f32.mrb[86].mxu1  ;;  %v7554_v44 = vsel %vm1068_vm4, %v7553_v31, %v7552_v47 }
 0xf27   :  { %v7555_v20 = vrot.slane %v7221_v60, 5  ;;  %v8748_v5 = vpop.f32.mrb[87].mxu1 }
 0xf29   :  { %v7556_v1 = vsel %vm1071_vm5, %v7555_v20, %v7554_v44 }
 0xf2a   :  { %v7377_v37 = vpop.f32.mrb[88].mxu1  ;;  %v7558_v42 = vsel %vm1074_vm6, %v7557_v2, %v7556_v1 }
 0xf2b   :  { %v7559_v14 = vrot.slane %v7377_v37, 3  ;;  %v8758_v63 = vpop.f32.mrb[89].mxu1 }
 0xf2d   :  { %v7560_v34 = vsel %vm1077_vm7, %v7559_v14, %v7558_v42 }
 0xf2e   :  { %v7533_v56 = vpop.f32.mrb[90].mxu1  ;;  %v7562_v13 = vsel %vm1080_vm8, %v7561_v3, %v7560_v34 }
 0xf2f   :  { %v7563_v4 = vrot.slane %v7533_v56, 1  ;;  %v8768_v6 = vpop.f32.mrb[91].mxu1 }
 0xf31   :  { %v7564_v7 = vsel %vm1083_vm9, %v7563_v4, %v7562_v13 }
 0xf32   :  { %v7637_v8 = vadd.f32 %v7636_v45, %v7564_v7 }
 0xf34   :  { %v7640_v40 = vmul.f32 0.25, %v7637_v8 }
 0xf36   :  { %v7641_v9 = vsel %vm1163_vm10, %v7640_v40, -inf }
 0xf37   :  { %7642 = vmax.xlane.f32.xlu0 %v7641_v9 }
 0xf3b   :  { %6758 = vadd.xlane.f32.xlu0 %v6757_v25 }
 0xfc4   :  { %v7643_v41 = vpop.xlane.xlu0 %7642 }
 0xfc5   :  { %v7644_v19 = vsub.f32 %v7640_v40, %v7643_v41 }
 0xfc7   :  { %v7645_v32 = vmul.f32 1.442695, %v7644_v19 }
 0xfc8   :  { %v6759_v43 = vpop.xlane.xlu0 %6758 }
 0xfc9   :  { %8935 = vpow2.f32 %v7645_v32 }
 0xfca   :  { %8937 = vrcp.f32 %v6759_v43 }
 0xfcb   :  { %8939 = vrcp.f32 %v5869_v30 }
 0xfd3   :  { %v8936_v18 = vpop.eup %8935 }
 0xfd4   :  { %v8938_v52 = vpop.eup %8937  ;;  %8777 = vmatmul.mubr.msk.f32.vlgmr.msra.gmra.mrb[92].mxu1 %vm1163_vm10, %v8936_v18  ;;  %v7647_v39 = vsel %vm1163_vm10, %v8936_v18, 0.0 }
 0xfd5   :  { %7648 = vadd.xlane.f32.xlu0 %v7647_v39  ;;  %v6838_v51 = vmul.f32 %v8938_v52, %v6834_v54  ;;  %v8940_v49 = vpop.eup %8939 }
 0xfd6   :  { %v5948_v33 = vmul.f32 %v8940_v49, %v10238_v35 }
 0xfd7   :  { %6840 = vrot.lane.b32.xlu1 %v6838_v51, %s9111_s9 }
 0xfd9   :  { %4986 = vadd.xlane.f32.xlu0 %v4985_v58 }
 0xfef   :  { %5950 = vrot.lane.b32.xlu0 %v5948_v33, %s9110_s0 }
0x1049   :  { %v6841_v50 = vpop.permute.xlu1 %6840 }
0x1062   :  { %v7649_v62 = vpop.xlane.xlu0 %7648 }
0x1066   :  { %v4987_v38 = vpop.xlane.xlu0 %4986 }
0x1067   :  { %8941 = vrcp.f32 %v4987_v38 }
0x1068   :  { %8943 = vrcp.f32 %v7649_v62 }
0x106a   :  { %v5951_v48 = vpop.permute.xlu0 %5950 }
0x1071   :  { %v8942_v23 = vpop.eup %8941 }
0x1072   :  { %v5062_v61 = vmul.f32 %v8942_v23, %v10176_v22  ;;  %v8944_v11 = vpop.eup %8943 }
0x1074   :  { %5063 = vst.msk [vmem:[#allocation5] sm:$0xff] %vm455_vm2, %v5062_v61 }
0x1075   :  { %5953 = vst.msk [vmem:[#allocation5] sm:$0xff] %vm2138_vm11, %v5951_v48 }
0x1076   :  { %6843 = vst.msk [vmem:[#allocation5] sm:$0xff] %vm3029_vm12, %v6841_v50 }
0x10a7   :  { %v7724_v21 = vpop.f32.mrb[92].mxu1 }
0x10a8   :  { %v7728_v35 = vmul.f32 %v8944_v11, %v7724_v21  ;;  %v8778_v28 = vpop.f32.mrb[93].mxu1 }
0x10aa   :  { %7730 = vrot.lane.b32.xlu0 %v7728_v35, %s9113_s11 }
0x111c   :  { %v7731_v46 = vpop.permute.xlu0 %7730 }
0x111d   :  { %7733 = vst.msk [vmem:[#allocation5] sm:$0xff] %vm3920_vm13, %v7731_v46 }
0x1124   :  { %v7734_v57 = vld [vmem:[#allocation5] sm:$0xff] }
0x1125   :  { %8796 = vmatmul.mubr.msk.f32.vlgmr.msra.gmra.mrb[80].mxu0 %vm149_vm1, %v7734_v57 }
0x11f8   :  { %v7804_v22 = vpop.f32.mrb[80].mxu0 }
0x11f9   :  { %v7805_v10 = vadd.f32 %v9840_v16, %v7804_v22  ;;  %v8797_v53 = vpop.f32.mrb[81].mxu0 }
0x11fb   :  { %7809 = vrot.lane.b32.xlu1 %v7805_v10, %s9112_s10 }
0x126d   :  { %v7810_v26 = vpop.permute.xlu1 %7809 }
0x126e   :  { %7813 = vst.msk [vmem:[#allocation15] sm:$0xff] %vm7812_vm14, %v7810_v26 }
0x126f   :  { %9077 = shalt.err (!%p9074_p2)
}
0x1270   :  { %s9078_s20 = scalar_lea.hbm %s10348_s8, 128 }
0x1271   :  { %p9079_p3 = scmp.ne.s32.totalorder %s10348_s8, %s9078_s20  ;;  %p9082_p4 = scmp.lt.u32.totalorder %s9078_s20, %s10348_s8 }
0x1273   :  { %p9084_p5 = pnand %p9082_p4, %p9079_p3 }
0x1275   :  { %9087 = shalt.err (!%p9084_p5)
}
0x1276   :  { %7823 = dma.vmem_to_hbm [thread:$0]  %s7821_s7, 128, %s10348_s8, [#allocation8]  }
0x1277   :  { %9094 = dma.done.wait [#allocation8], 128  }
0x1278   :  { %9095 = vsyncadd [#allocation8], 4294967168 }
0x1279   :  { %7827 = vsyncpa [#allocation7], 1 }
0x127a   :  { %7828 = vsyncpa [#allocation10], 1 }
0x127b   :  { %7829 = vsyncpa [#allocation13], 1 }
0x127c   :  { %7830 = vsyncpa [#allocation8], 1 }

</bundles_post_ra>
